<compile_context>
chip_gen: v6e
topology: v6e:2x2x1
jax: 0.10.0
libtpu: 0.0.40
codegen_flags: <defaults>
</compile_context>

<pallas_src>
import functools

import jax
import jax.numpy as jnp
from jax import lax
from jax.experimental import pallas as pl
from jax.experimental.pallas import tpu as pltpu

LANE = 128                 # lane tile (last-dim alignment)
TE = 512                   # edges per predictor block (review: 512-1024)
ADJ_DTYPE = jnp.bfloat16   # adjacency / A@x operand dtype (f32 for strict parity)


def _round_up(x, m):
    return (x + m - 1) // m * m


def _pad2(a, rows, cols):
    return jnp.pad(a, ((0, rows - a.shape[0]), (0, cols - a.shape[1])))


def _vmem_budget_bytes():
    """Device-aware VMEM budget: ~7/8 of physical, capped at 112 MiB."""
    try:
        cap = int(pltpu.get_tpu_info().vmem_capacity_bytes)
    except Exception:           # pragma: no cover - conservative fallback
        cap = 64 * 1024 * 1024  # safe even on v7x (64 MiB physical per TC)
    return int(min(cap * 7 // 8, 112 * 1024 * 1024))


def _gcn_adjacency(u_idx, p_idx_local, nu, npr):
    """Symmetric GCN normalization with self loops, bipartite block form.

    Returns (A_up [nu,np], A_pu [np,nu], 1/deg_u [nu], 1/deg_p [np]).
    TODO(synk): dense O(nu*np) host-side construction is the real scalability
    ceiling before any kernel limit is hit.
    """
    cnt = jnp.zeros((nu, npr), jnp.float32).at[u_idx, p_idx_local].add(1.0)
    deg_u = jnp.sum(cnt, axis=1) + 1.0      # + self loop
    deg_p = jnp.sum(cnt, axis=0) + 1.0
    diu = 1.0 / jnp.sqrt(deg_u)
    dip = 1.0 / jnp.sqrt(deg_p)
    aup = diu[:, None] * cnt * dip[None, :]      # messages product -> user
    apu = dip[:, None] * cnt.T * diu[None, :]    # messages user -> product
    return aup, apu, 1.0 / deg_u, 1.0 / deg_p


# --------------------------------------------------------------------------- #
# Kernel 1: node pipeline (feature transforms + 2 GCN layers + BN folds + skips)
# --------------------------------------------------------------------------- #
def _make_node_kernel(nu_pad, n_pad):
    def node_kernel(uf_ref, pf_ref, aup_ref, apu_ref, sd_ref,
                    wu_ref, wp_ref, w1_ref, w2_ref, pv_ref,
                    x_out, ag_ref):
        f32 = jnp.float32
        bu = pv_ref[0:1, :]
        bp = pv_ref[1:2, :]
        s1 = pv_ref[2:3, :]
        t1 = pv_ref[3:4, :]
        s2 = pv_ref[4:5, :]
        t2 = pv_ref[5:6, :]

        # user / product feature transforms (nn.Linear), written into the
        # stacked node buffer (users on rows [0:nu_pad), products after).
        x_out[0:nu_pad, :] = (
            jnp.dot(uf_ref[...], wu_ref[...], preferred_element_type=f32) + bu)
        x_out[nu_pad:n_pad, :] = (
            jnp.dot(pf_ref[...], wp_ref[...], preferred_element_type=f32) + bp)

        aup = aup_ref[...]          # bf16, fed straight to the MXU (no upcast)
        apu = apu_ref[...]
        sd = sd_ref[...]            # (n_pad, 1) self-loop diagonal (1/deg)

        def gcn_bn(scale, shift, w_ref):
            # A_hat @ x in bipartite block form: bf16 x bf16 MXU, f32 accumulate.
            xu_b = x_out[0:nu_pad, :].astype(ADJ_DTYPE)
            xp_b = x_out[nu_pad:n_pad, :].astype(ADJ_DTYPE)
            ag_ref[0:nu_pad, :] = jnp.dot(aup, xp_b, preferred_element_type=f32)
            ag_ref[nu_pad:n_pad, :] = jnp.dot(apu, xu_b, preferred_element_type=f32)
            ag = ag_ref[...] + sd * x_out[...]        # + self-loop term (f32)
            # Shared-weight matmul over the stacked users++products stream:
            # one MXU weight push / result drain instead of two per layer.
            h = jnp.dot(ag, w_ref[...], preferred_element_type=f32)
            return h * scale + shift                  # GCN bias + BN(eval) folded

        h1 = gcn_bn(s1, t1, w1_ref)
        x_out[...] = jnp.maximum(h1, 0.0) + x_out[...]   # relu, dropout(eval)=id, skip
        h2 = gcn_bn(s2, t2, w2_ref)
        x_out[...] = h2 + x_out[...]                     # second skip

    return node_kernel


# --------------------------------------------------------------------------- #
# Kernel 2: predictor over edge blocks (transposed layout -> lane-dense output)
# --------------------------------------------------------------------------- #
def _edge_kernel(ue_ref, pe_ref, w_ref, b_ref, out_ref):
    ue = ue_ref[...]                   # (d_pad, TE): features on sublanes
    pe = pe_ref[...]
    nsu = jnp.sum(ue * ue, axis=0, keepdims=True)      # (1, TE)
    nsp = jnp.sum(pe * pe, axis=0, keepdims=True)
    # F.normalize eps: 1/max(||v||,1e-12) == rsqrt(max(||v||^2,1e-24))  (EUP)
    inv = lax.rsqrt(jnp.maximum(nsu, 1e-24)) * lax.rsqrt(jnp.maximum(nsp, 1e-24))
    s = jnp.sum(ue * pe * w_ref[...], axis=0, keepdims=True)   # (1, TE)
    out_ref[...] = s * inv + b_ref[...]                # lane-dense (1, TE) store


def gnn_forward(edge_index, user_features, product_features, params):
    nu, ufd = user_features.shape
    npr, pfd = product_features.shape
    d = params["wu"].shape[1]
    e = edge_index.shape[1]

    u_idx = edge_index[0]              # user node ids (< nu)
    p_idx = edge_index[1] - nu         # local product ids

    # lane/sublane aligned padded sizes
    d_pad = _round_up(d, LANE)
    ufd_pad = _round_up(ufd, LANE)
    pfd_pad = _round_up(pfd, LANE)
    nu_pad = _round_up(nu, LANE)
    np_pad = _round_up(npr, LANE)
    n_pad = nu_pad + np_pad
    e_pad = _round_up(e, TE)

    # bipartite normalized adjacency blocks (bf16) + stacked self-loop diagonal
    aup, apu, sdu, sdp = _gcn_adjacency(u_idx, p_idx, nu, npr)
    aup = _pad2(aup, nu_pad, np_pad).astype(ADJ_DTYPE)
    apu = _pad2(apu, np_pad, nu_pad).astype(ADJ_DTYPE)
    sd = jnp.concatenate([jnp.pad(sdu, (0, nu_pad - nu)),
                          jnp.pad(sdp, (0, np_pad - npr))])[:, None]  # (n_pad, 1)

    # fold GCN bias + BatchNorm1d (eval) into per-feature scale/shift and pack
    # the six [d] parameter vectors into a single (8, d_pad) operand (one DMA).
    eps = 1e-5
    s1 = params["bn1_gamma"] / jnp.sqrt(params["bn1_var"] + eps)
    t1 = (params["b1"] - params["bn1_mean"]) * s1 + params["bn1_beta"]
    s2 = params["bn2_gamma"] / jnp.sqrt(params["bn2_var"] + eps)
    t2 = (params["b2"] - params["bn2_mean"]) * s2 + params["bn2_beta"]
    pvec = jnp.zeros((8, d_pad), jnp.float32)
    for row, vec in enumerate((params["bu"], params["bp"], s1, t1, s2, t2)):
        pvec = pvec.at[row, :d].set(vec)

    node_inputs = (
        _pad2(user_features, nu_pad, ufd_pad),
        _pad2(product_features, np_pad, pfd_pad),
        aup, apu, sd,
        _pad2(params["wu"], ufd_pad, d_pad),
        _pad2(params["wp"], pfd_pad, d_pad),
        _pad2(params["w1"], d_pad, d_pad),
        _pad2(params["w2"], d_pad, d_pad),
        pvec,
    )

    vmem = functools.partial(pl.BlockSpec, memory_space=pltpu.MemorySpace.VMEM)
    x2 = pl.pallas_call(
        _make_node_kernel(nu_pad, n_pad),
        out_shape=jax.ShapeDtypeStruct((n_pad, d_pad), jnp.float32),
        in_specs=[vmem() for _ in node_inputs],
        out_specs=vmem(),
        scratch_shapes=[pltpu.VMEM((n_pad, d_pad), jnp.float32)],
        compiler_params=pltpu.CompilerParams(
            vmem_limit_bytes=_vmem_budget_bytes()),
    )(*node_inputs)

    # Fused gather+transpose: transpose once at node-count size, then a single
    # lane-axis gather emits the (d_pad, e) operands directly (one HBM pass).
    # TODO(synk): for very large E, move this gather into the edge kernel via
    # PrefetchScalarGridSpec + memory_space=pl.ANY manual DMA.
    x2_t = x2.T                                           # (d_pad, n_pad)
    ue_t = jnp.pad(x2_t[:, u_idx], ((0, 0), (0, e_pad - e)))
    pe_t = jnp.pad(x2_t[:, nu_pad + p_idx], ((0, 0), (0, e_pad - e)))

    w_col = _pad2(params["wpred"], d_pad, 1)              # (d_pad, 1)
    b_arr = params["bpred"].reshape(1, 1).astype(jnp.float32)

    # TODO(synk): if profiling shows exposed DMA here, add
    # pipeline_mode=pl.Buffered(3) on the two big in_specs.
    out = pl.pallas_call(
        _edge_kernel,
        out_shape=jax.ShapeDtypeStruct((1, e_pad), jnp.float32),
        grid=(e_pad // TE,),
        in_specs=[
            pl.BlockSpec((d_pad, TE), lambda i: (0, i)),
            pl.BlockSpec((d_pad, TE), lambda i: (0, i)),
            pl.BlockSpec((d_pad, 1), lambda i: (0, 0)),
            pl.BlockSpec((1, 1), lambda i: (0, 0)),
        ],
        out_specs=pl.BlockSpec((1, TE), lambda i: (0, i)),
        compiler_params=pltpu.CompilerParams(
            dimension_semantics=("parallel",),
            vmem_limit_bytes=32 * 1024 * 1024),
    )(ue_t, pe_t, w_col, b_arr)
    return out[0, :e]                  # .squeeze()


def reference_forward(edge_index, uf, pf, params):
    """Pure-JAX exact-f32 dense reference (eval mode, full N x N adjacency)."""
    hp = lax.Precision.HIGHEST
    nu = uf.shape[0]
    n = nu + pf.shape[0]
    u_idx = edge_index[0]
    p_idx = edge_index[1]              # global product ids

    src = jnp.concatenate([u_idx, p_idx])
    dst = jnp.concatenate([p_idx, u_idx])
    adj = jnp.zeros((n, n), jnp.float32).at[dst, src].add(1.0)
    adj = adj + jnp.eye(n, dtype=jnp.float32)            # self loops
    deg = jnp.sum(adj, axis=1)
    dinv = 1.0 / jnp.sqrt(deg)
    a_hat = dinv[:, None] * adj * dinv[None, :]

    user_x = jnp.dot(uf, params["wu"], precision=hp) + params["bu"]
    prod_x = jnp.dot(pf, params["wp"], precision=hp) + params["bp"]
    x = jnp.concatenate([user_x, prod_x], axis=0)

    def gcn(h, w, b):
        return jnp.dot(jnp.dot(a_hat, h, precision=hp), w, precision=hp) + b

    def bn(h, g, bta, m, v):
        return (h - m) / jnp.sqrt(v + 1e-5) * g + bta

    h1 = bn(gcn(x, params["w1"], params["b1"]),
            params["bn1_gamma"], params["bn1_beta"],
            params["bn1_mean"], params["bn1_var"])
    x1 = jax.nn.relu(h1) + x           # dropout(eval) = identity
    h2 = bn(gcn(x1, params["w2"], params["b2"]),
            params["bn2_gamma"], params["bn2_beta"],
            params["bn2_mean"], params["bn2_var"])
    x2 = h2 + x1

    ue = x2[u_idx]
    pe = x2[p_idx]

    def l2norm(v):
        nrm = jnp.sqrt(jnp.sum(v * v, axis=-1, keepdims=True))
        return v / jnp.maximum(nrm, 1e-12)

    dp = l2norm(ue) * l2norm(pe)
    return (jnp.dot(dp, params["wpred"], precision=hp) + params["bpred"])[:, 0]


def init_params(key, user_feature_dim, product_feature_dim, embedding_dim):
    ks = jax.random.split(key, 13)

    def lin(k, fan_in, fan_out):
        bound = 1.0 / jnp.sqrt(fan_in)
        kw, kb = jax.random.split(k)
        w = jax.random.uniform(kw, (fan_in, fan_out), jnp.float32, -bound, bound)
        b = jax.random.uniform(kb, (fan_out,), jnp.float32, -bound, bound)
        return w, b

    d = embedding_dim
    wu, bu = lin(ks[0], user_feature_dim, d)
    wp, bp = lin(ks[1], product_feature_dim, d)
    w1, b1 = lin(ks[2], d, d)          # GCNConv1 weight + bias
    w2, b2 = lin(ks[3], d, d)          # GCNConv2
    wpred, bpred = lin(ks[4], d, 1)

    return dict(
        wu=wu, bu=bu, wp=wp, bp=bp,
        w1=w1, b1=b1, w2=w2, b2=b2,
        wpred=wpred, bpred=bpred,
        bn1_gamma=1.0 + 0.1 * jax.random.normal(ks[5], (d,), jnp.float32),
        bn1_beta=0.1 * jax.random.normal(ks[6], (d,), jnp.float32),
        bn1_mean=0.1 * jax.random.normal(ks[7], (d,), jnp.float32),
        bn1_var=1.0 + 0.1 * jax.random.uniform(ks[8], (d,), jnp.float32),
        bn2_gamma=1.0 + 0.1 * jax.random.normal(ks[9], (d,), jnp.float32),
        bn2_beta=0.1 * jax.random.normal(ks[10], (d,), jnp.float32),
        bn2_mean=0.1 * jax.random.normal(ks[11], (d,), jnp.float32),
        bn2_var=1.0 + 0.1 * jax.random.uniform(ks[12], (d,), jnp.float32),
    )


if __name__ == "__main__":
    NUM_USERS = 8
    NUM_PRODUCTS = 8
    USER_FEATURE_DIM = 16
    PRODUCT_FEATURE_DIM = 24
    EMBEDDING_DIM = 32
    NUM_EDGES = 8

    key = jax.random.PRNGKey(0)
    k_uf, k_pf, k_param = jax.random.split(key, 3)

    user_features = jax.random.normal(k_uf, (NUM_USERS, USER_FEATURE_DIM), jnp.float32)
    product_features = jax.random.normal(k_pf, (NUM_PRODUCTS, PRODUCT_FEATURE_DIM), jnp.float32)

    # edge_index: row 0 = user node ids, row 1 = global product node ids
    users = jnp.arange(NUM_EDGES, dtype=jnp.int32) % NUM_USERS
    products = NUM_USERS + (jnp.arange(NUM_EDGES, dtype=jnp.int32) * 3) % NUM_PRODUCTS
    edge_index = jnp.stack([users, products], axis=0)

    params = init_params(k_param, USER_FEATURE_DIM, PRODUCT_FEATURE_DIM, EMBEDDING_DIM)

    # TODO(synk): training-mode dropout / batch-statistic BatchNorm are stochastic /
    # batch-dependent; eval-mode semantics (identity dropout, running stats) are used.

    out = jax.block_until_ready(gnn_forward(edge_index, user_features, product_features, params))
    ref = jax.block_until_ready(reference_forward(edge_index, user_features, product_features, params))

    assert out.shape == (NUM_EDGES,), out.shape
    # Tolerance accounts for the documented bf16 quantization of the normalized
    # adjacency and of the A@x matmul operands (full-rate MXU path); the
    # reference is exact f32.  Set ADJ_DTYPE = jnp.float32 for strict parity.
    assert jnp.allclose(out, ref, atol=1e-2, rtol=1e-2), (out, ref)
    print("KERNEL_OK")
</pallas_src>

<mosaic_0001>
module attributes {stable_mosaic.version = 11 : i64} {
  func.func @node_kernel(%arg0: memref<128x128xf32, #tpu.memory_space<vmem>>, %arg1: memref<128x128xf32, #tpu.memory_space<vmem>>, %arg2: memref<128x128xbf16, #tpu.memory_space<vmem>>, %arg3: memref<128x128xbf16, #tpu.memory_space<vmem>>, %arg4: memref<256x1xf32, #tpu.memory_space<vmem>>, %arg5: memref<128x128xf32, #tpu.memory_space<vmem>>, %arg6: memref<128x128xf32, #tpu.memory_space<vmem>>, %arg7: memref<128x128xf32, #tpu.memory_space<vmem>>, %arg8: memref<128x128xf32, #tpu.memory_space<vmem>>, %arg9: memref<8x128xf32, #tpu.memory_space<vmem>>, %arg10: memref<256x128xf32, #tpu.memory_space<vmem>>, %arg11: memref<256x128xf32, #tpu.memory_space<vmem>>) attributes {dimension_semantics = [], scalar_prefetch = 0 : i64, scratch_operands = 1 : i64, tpu.core_type = #tpu.core_type<tc>} {
    %c0 = arith.constant 0 : index
    %c0_0 = arith.constant 0 : index
    %0 = vector.load %arg9[%c0, %c0_0] : memref<8x128xf32, #tpu.memory_space<vmem>>, vector<1x128xf32>
    %c1 = arith.constant 1 : index
    %c0_1 = arith.constant 0 : index
    %1 = vector.load %arg9[%c1, %c0_1] : memref<8x128xf32, #tpu.memory_space<vmem>>, vector<1x128xf32>
    %c2 = arith.constant 2 : index
    %c0_2 = arith.constant 0 : index
    %2 = vector.load %arg9[%c2, %c0_2] : memref<8x128xf32, #tpu.memory_space<vmem>>, vector<1x128xf32>
    %c3 = arith.constant 3 : index
    %c0_3 = arith.constant 0 : index
    %3 = vector.load %arg9[%c3, %c0_3] : memref<8x128xf32, #tpu.memory_space<vmem>>, vector<1x128xf32>
    %c4 = arith.constant 4 : index
    %c0_4 = arith.constant 0 : index
    %4 = vector.load %arg9[%c4, %c0_4] : memref<8x128xf32, #tpu.memory_space<vmem>>, vector<1x128xf32>
    %c5 = arith.constant 5 : index
    %c0_5 = arith.constant 0 : index
    %5 = vector.load %arg9[%c5, %c0_5] : memref<8x128xf32, #tpu.memory_space<vmem>>, vector<1x128xf32>
    %c0_6 = arith.constant 0 : index
    %c0_7 = arith.constant 0 : index
    %6 = vector.load %arg0[%c0_6, %c0_7] : memref<128x128xf32, #tpu.memory_space<vmem>>, vector<128x128xf32>
    %c0_8 = arith.constant 0 : index
    %c0_9 = arith.constant 0 : index
    %7 = vector.load %arg5[%c0_8, %c0_9] : memref<128x128xf32, #tpu.memory_space<vmem>>, vector<128x128xf32>
    %cst = arith.constant dense<0.000000e+00> : vector<128x128xf32>
    %8 = tpu.matmul %6, %7, %cst {dimension_numbers = #tpu.dot_dimension_numbers<[1], [0], [0], [1], [0, 0, 1, 1], [], []>} : vector<128x128xf32>, vector<128x128xf32>, vector<128x128xf32> -> vector<128x128xf32>
    %9 = vector.broadcast %0 : vector<1x128xf32> to vector<128x128xf32>
    %10 = arith.addf %8, %9 : vector<128x128xf32>
    %c0_10 = arith.constant 0 : index
    %c0_11 = arith.constant 0 : index
    %11 = vector.load %arg10[%c0_10, %c0_11] : memref<256x128xf32, #tpu.memory_space<vmem>>, vector<128x128xf32>
    tpu.vector_store %arg10[%c0_10, %c0_11], %10 {strides = array<i32>} : memref<256x128xf32, #tpu.memory_space<vmem>>, vector<128x128xf32>,
    %c0_12 = arith.constant 0 : index
    %c0_13 = arith.constant 0 : index
    %12 = vector.load %arg1[%c0_12, %c0_13] : memref<128x128xf32, #tpu.memory_space<vmem>>, vector<128x128xf32>
    %c0_14 = arith.constant 0 : index
    %c0_15 = arith.constant 0 : index
    %13 = vector.load %arg6[%c0_14, %c0_15] : memref<128x128xf32, #tpu.memory_space<vmem>>, vector<128x128xf32>
    %cst_16 = arith.constant dense<0.000000e+00> : vector<128x128xf32>
    %14 = tpu.matmul %12, %13, %cst_16 {dimension_numbers = #tpu.dot_dimension_numbers<[1], [0], [0], [1], [0, 0, 1, 1], [], []>} : vector<128x128xf32>, vector<128x128xf32>, vector<128x128xf32> -> vector<128x128xf32>
    %15 = vector.broadcast %1 : vector<1x128xf32> to vector<128x128xf32>
    %16 = arith.addf %14, %15 : vector<128x128xf32>
    %c128 = arith.constant 128 : index
    %c0_17 = arith.constant 0 : index
    %17 = vector.load %arg10[%c128, %c0_17] : memref<256x128xf32, #tpu.memory_space<vmem>>, vector<128x128xf32>
    tpu.vector_store %arg10[%c128, %c0_17], %16 {strides = array<i32>} : memref<256x128xf32, #tpu.memory_space<vmem>>, vector<128x128xf32>,
    %c0_18 = arith.constant 0 : index
    %c0_19 = arith.constant 0 : index
    %18 = vector.load %arg2[%c0_18, %c0_19] : memref<128x128xbf16, #tpu.memory_space<vmem>>, vector<128x128xbf16>
    %c0_20 = arith.constant 0 : index
    %c0_21 = arith.constant 0 : index
    %19 = vector.load %arg3[%c0_20, %c0_21] : memref<128x128xbf16, #tpu.memory_space<vmem>>, vector<128x128xbf16>
    %c0_22 = arith.constant 0 : index
    %c0_23 = arith.constant 0 : index
    %20 = vector.load %arg4[%c0_22, %c0_23] : memref<256x1xf32, #tpu.memory_space<vmem>>, vector<256x1xf32>
    %c0_24 = arith.constant 0 : index
    %c0_25 = arith.constant 0 : index
    %21 = vector.load %arg10[%c0_24, %c0_25] : memref<256x128xf32, #tpu.memory_space<vmem>>, vector<128x128xf32>
    %22 = arith.truncf %21 : vector<128x128xf32> to vector<128x128xbf16>
    %c128_26 = arith.constant 128 : index
    %c0_27 = arith.constant 0 : index
    %23 = vector.load %arg10[%c128_26, %c0_27] : memref<256x128xf32, #tpu.memory_space<vmem>>, vector<128x128xf32>
    %24 = arith.truncf %23 : vector<128x128xf32> to vector<128x128xbf16>
    %cst_28 = arith.constant dense<0.000000e+00> : vector<128x128xf32>
    %25 = tpu.matmul %18, %24, %cst_28 {dimension_numbers = #tpu.dot_dimension_numbers<[1], [0], [0], [1], [0, 0, 1, 1], [], []>} : vector<128x128xbf16>, vector<128x128xbf16>, vector<128x128xf32> -> vector<128x128xf32>
    %c0_29 = arith.constant 0 : index
    %c0_30 = arith.constant 0 : index
    %26 = vector.load %arg11[%c0_29, %c0_30] : memref<256x128xf32, #tpu.memory_space<vmem>>, vector<128x128xf32>
    tpu.vector_store %arg11[%c0_29, %c0_30], %25 {strides = array<i32>} : memref<256x128xf32, #tpu.memory_space<vmem>>, vector<128x128xf32>,
    %cst_31 = arith.constant dense<0.000000e+00> : vector<128x128xf32>
    %27 = tpu.matmul %19, %22, %cst_31 {dimension_numbers = #tpu.dot_dimension_numbers<[1], [0], [0], [1], [0, 0, 1, 1], [], []>} : vector<128x128xbf16>, vector<128x128xbf16>, vector<128x128xf32> -> vector<128x128xf32>
    %c128_32 = arith.constant 128 : index
    %c0_33 = arith.constant 0 : index
    %28 = vector.load %arg11[%c128_32, %c0_33] : memref<256x128xf32, #tpu.memory_space<vmem>>, vector<128x128xf32>
    tpu.vector_store %arg11[%c128_32, %c0_33], %27 {strides = array<i32>} : memref<256x128xf32, #tpu.memory_space<vmem>>, vector<128x128xf32>,
    %c0_34 = arith.constant 0 : index
    %c0_35 = arith.constant 0 : index
    %29 = vector.load %arg11[%c0_34, %c0_35] : memref<256x128xf32, #tpu.memory_space<vmem>>, vector<256x128xf32>
    %c0_36 = arith.constant 0 : index
    %c0_37 = arith.constant 0 : index
    %30 = vector.load %arg10[%c0_36, %c0_37] : memref<256x128xf32, #tpu.memory_space<vmem>>, vector<256x128xf32>
    %31 = vector.broadcast %20 : vector<256x1xf32> to vector<256x128xf32>
    %32 = arith.mulf %31, %30 : vector<256x128xf32>
    %33 = arith.addf %29, %32 : vector<256x128xf32>
    %c0_38 = arith.constant 0 : index
    %c0_39 = arith.constant 0 : index
    %34 = vector.load %arg7[%c0_38, %c0_39] : memref<128x128xf32, #tpu.memory_space<vmem>>, vector<128x128xf32>
    %cst_40 = arith.constant dense<0.000000e+00> : vector<256x128xf32>
    %35 = tpu.matmul %33, %34, %cst_40 {dimension_numbers = #tpu.dot_dimension_numbers<[1], [0], [0], [1], [0, 0, 1, 1], [], []>} : vector<256x128xf32>, vector<128x128xf32>, vector<256x128xf32> -> vector<256x128xf32>
    %36 = vector.broadcast %2 : vector<1x128xf32> to vector<256x128xf32>
    %37 = arith.mulf %35, %36 : vector<256x128xf32>
    %38 = vector.broadcast %3 : vector<1x128xf32> to vector<256x128xf32>
    %39 = arith.addf %37, %38 : vector<256x128xf32>
    %cst_41 = arith.constant 0.000000e+00 : f32
    %40 = vector.broadcast %cst_41 : f32 to vector<256x128xf32>
    %41 = arith.maximumf %39, %40 : vector<256x128xf32>
    %c0_42 = arith.constant 0 : index
    %c0_43 = arith.constant 0 : index
    %42 = vector.load %arg10[%c0_42, %c0_43] : memref<256x128xf32, #tpu.memory_space<vmem>>, vector<256x128xf32>
    %43 = arith.addf %41, %42 : vector<256x128xf32>
    %c0_44 = arith.constant 0 : index
    %c0_45 = arith.constant 0 : index
    %44 = vector.load %arg10[%c0_44, %c0_45] : memref<256x128xf32, #tpu.memory_space<vmem>>, vector<256x128xf32>
    tpu.vector_store %arg10[%c0_44, %c0_45], %43 {strides = array<i32>} : memref<256x128xf32, #tpu.memory_space<vmem>>, vector<256x128xf32>,
    %c0_46 = arith.constant 0 : index
    %c0_47 = arith.constant 0 : index
    %45 = vector.load %arg10[%c0_46, %c0_47] : memref<256x128xf32, #tpu.memory_space<vmem>>, vector<128x128xf32>
    %46 = arith.truncf %45 : vector<128x128xf32> to vector<128x128xbf16>
    %c128_48 = arith.constant 128 : index
    %c0_49 = arith.constant 0 : index
    %47 = vector.load %arg10[%c128_48, %c0_49] : memref<256x128xf32, #tpu.memory_space<vmem>>, vector<128x128xf32>
    %48 = arith.truncf %47 : vector<128x128xf32> to vector<128x128xbf16>
    %cst_50 = arith.constant dense<0.000000e+00> : vector<128x128xf32>
    %49 = tpu.matmul %18, %48, %cst_50 {dimension_numbers = #tpu.dot_dimension_numbers<[1], [0], [0], [1], [0, 0, 1, 1], [], []>} : vector<128x128xbf16>, vector<128x128xbf16>, vector<128x128xf32> -> vector<128x128xf32>
    %c0_51 = arith.constant 0 : index
    %c0_52 = arith.constant 0 : index
    %50 = vector.load %arg11[%c0_51, %c0_52] : memref<256x128xf32, #tpu.memory_space<vmem>>, vector<128x128xf32>
    tpu.vector_store %arg11[%c0_51, %c0_52], %49 {strides = array<i32>} : memref<256x128xf32, #tpu.memory_space<vmem>>, vector<128x128xf32>,
    %cst_53 = arith.constant dense<0.000000e+00> : vector<128x128xf32>
    %51 = tpu.matmul %19, %46, %cst_53 {dimension_numbers = #tpu.dot_dimension_numbers<[1], [0], [0], [1], [0, 0, 1, 1], [], []>} : vector<128x128xbf16>, vector<128x128xbf16>, vector<128x128xf32> -> vector<128x128xf32>
    %c128_54 = arith.constant 128 : index
    %c0_55 = arith.constant 0 : index
    %52 = vector.load %arg11[%c128_54, %c0_55] : memref<256x128xf32, #tpu.memory_space<vmem>>, vector<128x128xf32>
    tpu.vector_store %arg11[%c128_54, %c0_55], %51 {strides = array<i32>} : memref<256x128xf32, #tpu.memory_space<vmem>>, vector<128x128xf32>,
    %c0_56 = arith.constant 0 : index
    %c0_57 = arith.constant 0 : index
    %53 = vector.load %arg11[%c0_56, %c0_57] : memref<256x128xf32, #tpu.memory_space<vmem>>, vector<256x128xf32>
    %c0_58 = arith.constant 0 : index
    %c0_59 = arith.constant 0 : index
    %54 = vector.load %arg10[%c0_58, %c0_59] : memref<256x128xf32, #tpu.memory_space<vmem>>, vector<256x128xf32>
    %55 = vector.broadcast %20 : vector<256x1xf32> to vector<256x128xf32>
    %56 = arith.mulf %55, %54 : vector<256x128xf32>
    %57 = arith.addf %53, %56 : vector<256x128xf32>
    %c0_60 = arith.constant 0 : index
    %c0_61 = arith.constant 0 : index
    %58 = vector.load %arg8[%c0_60, %c0_61] : memref<128x128xf32, #tpu.memory_space<vmem>>, vector<128x128xf32>
    %cst_62 = arith.constant dense<0.000000e+00> : vector<256x128xf32>
    %59 = tpu.matmul %57, %58, %cst_62 {dimension_numbers = #tpu.dot_dimension_numbers<[1], [0], [0], [1], [0, 0, 1, 1], [], []>} : vector<256x128xf32>, vector<128x128xf32>, vector<256x128xf32> -> vector<256x128xf32>
    %60 = vector.broadcast %4 : vector<1x128xf32> to vector<256x128xf32>
    %61 = arith.mulf %59, %60 : vector<256x128xf32>
    %62 = vector.broadcast %5 : vector<1x128xf32> to vector<256x128xf32>
    %63 = arith.addf %61, %62 : vector<256x128xf32>
    %c0_63 = arith.constant 0 : index
    %c0_64 = arith.constant 0 : index
    %64 = vector.load %arg10[%c0_63, %c0_64] : memref<256x128xf32, #tpu.memory_space<vmem>>, vector<256x128xf32>
    %65 = arith.addf %63, %64 : vector<256x128xf32>
    %c0_65 = arith.constant 0 : index
    %c0_66 = arith.constant 0 : index
    %66 = vector.load %arg10[%c0_65, %c0_66] : memref<256x128xf32, #tpu.memory_space<vmem>>, vector<256x128xf32>
    tpu.vector_store %arg10[%c0_65, %c0_66], %65 {strides = array<i32>} : memref<256x128xf32, #tpu.memory_space<vmem>>, vector<256x128xf32>,
    return
  }
}

</mosaic_0001>

<bundles_post_ra>
// kernel: tpu_custom_call.1
= control target key start
LH: loop header
LB: loop body
LE: loop exit
PB: predicated region body
PF: predicated region fallthrough
CT: control target
= control target key end

     0   :  { %15 = vsyncpa [#allocation4], 0  ;;  %s4323_s0 = inlined_call_operand.vmem [shape: f32[128,128], index: 0, kind: input, shape index: {}]   ;;  %s4324_s1 = inlined_call_operand.vmem [shape: f32[128,128], index: 1, kind: input, shape index: {}]   ;;  %s4325_s2 = inlined_call_operand.hbm [shape: bf16[128,128], index: 2, kind: input, shape index: {}]   ;;  %s4326_s3 = inlined_call_operand.hbm [shape: bf16[128,128], index: 3, kind: input, shape index: {}]   ;;  %s4327_s4 = inlined_call_operand.vmem [shape: f32[256,1], index: 4, kind: input, shape index: {}]   ;;  %s4328_s5 = inlined_call_operand.hbm [shape: f32[128,128], index: 5, kind: input, shape index: {}]   ;;  %s4329_s6 = inlined_call_operand.hbm [shape: f32[128,128], index: 6, kind: input, shape index: {}]   ;;  %s4330_s7 = inlined_call_operand.hbm [shape: f32[128,128], index: 7, kind: input, shape index: {}]   ;;  %s4331_s8 = inlined_call_operand.hbm [shape: f32[128,128], index: 8, kind: input, shape index: {}]   ;;  %s4332_s9 = inlined_call_operand.vmem [shape: f32[8,128], index: 9, kind: input, shape index: {}]   ;;  %s4333_s10 = inlined_call_operand.hbm [shape: f32[256,128], index: 10, kind: output, shape index: {}]  }
   0x1   :  { %16 = vsyncpa [#allocation7], 0 }
   0x2   :  { %17 = vsyncpa [#allocation10], 0 }
   0x3   :  { %18 = vsyncpa [#allocation13], 0 }
   0x4   :  { %19 = vsyncpa [#allocation5], 0  ;;  %s3280_s13 = smov [#allocation6]  }
   0x5   :  { %s41_s14 = sshll.u32 %s3280_s13, 4  ;;  %s42_s14 = int_to_ptr.vmem [resolvable:$true] %s41_s14 }
   0x6   :  { %s3138_s15 = scalar_lea.vmem %s42_s14, 1024  ;;  %p3143_p1 = scmp.lt.s32.totalorder %s42_s14, %s42_s14 }
   0x7   :  { %p3139_p0 = scmp.ne.s32.totalorder %s42_s14, %s3138_s15  ;;  %p3144_p2 = scmp.lt.s32.totalorder %s3138_s15, %s3138_s15 }
   0x9   :  { %p3145_p3 = por %p3144_p2, %p3143_p1 }
   0xb   :  { %p3146_p4 = pnand %p3145_p3, %p3139_p0 }
   0xd   :  { %3149 = shalt.err (!%p3146_p4)
}
   0xe   :  { %s3281_s16 = smov 64   ;;  %s3282_s17 = smov 4  }
   0xf   :  { %47 = dma.hbm_to_vmem [thread:$0]  %s4326_s3, 1024, %s42_s14, [#allocation7], %s3281_s16, %s3281_s16, %s3282_s17  }
  0x10   :  { %s3283_s20 = smov [#allocation9]   ;;  %s3284_s22 = smov [#allocation3]  }
  0x11   :  { %s67_s21 = sshll.u32 %s3283_s20, 4  ;;  %s29_s23 = sshll.u32 %s3284_s22, 4  ;;  %s68_s21 = int_to_ptr.vmem [resolvable:$true] %s67_s21  ;;  %s30_s23 = int_to_ptr.vmem [resolvable:$true] %s29_s23 }
  0x12   :  { %s3158_s24 = scalar_lea.vmem %s68_s21, 2048  ;;  %p3163_p6 = scmp.lt.s32.totalorder %s68_s21, %s68_s21 }
  0x13   :  { %p3159_p5 = scmp.ne.s32.totalorder %s68_s21, %s3158_s24  ;;  %p3164_p7 = scmp.lt.s32.totalorder %s3158_s24, %s3158_s24 }
  0x15   :  { %p3165_p8 = por %p3164_p7, %p3163_p6 }
  0x17   :  { %p3166_p9 = pnand %p3165_p8, %p3159_p5 }
  0x19   :  { %3169 = shalt.err (!%p3166_p9)
}
  0x1a   :  { %s3285_s25 = smov 128   ;;  %s3286_s26 = smov 8  }
  0x1b   :  { %73 = dma.hbm_to_vmem [thread:$0]  %s4329_s6, 2048, %s68_s21, [#allocation10], %s3285_s25, %s3285_s25, %s3286_s26  }
  0x1c   :  { %s3178_s3 = scalar_lea.vmem %s30_s23, 1024  ;;  %p3183_p11 = scmp.lt.s32.totalorder %s30_s23, %s30_s23 }
  0x1d   :  { %p3179_p10 = scmp.ne.s32.totalorder %s30_s23, %s3178_s3  ;;  %p3184_p12 = scmp.lt.s32.totalorder %s3178_s3, %s3178_s3 }
  0x1f   :  { %p3185_p13 = por %p3184_p12, %p3183_p11 }
  0x21   :  { %p3186_p0 = pnand %p3185_p13, %p3179_p10 }
  0x23   :  { %3189 = shalt.err (!%p3186_p0)
}
  0x24   :  { %35 = dma.hbm_to_vmem [thread:$0]  %s4325_s2, 1024, %s30_s23, [#allocation4], %s3281_s16, %s3281_s16, %s3282_s17  }
  0x25   :  { %s3287_s11 = smov [#allocation8]   ;;  %s3288_s13 = smov [#allocation11]  }
  0x26   :  { %s55_s12 = sshll.u32 %s3287_s11, 4  ;;  %s79_s14 = sshll.u32 %s3288_s13, 4  ;;  %s56_s12 = int_to_ptr.vmem [resolvable:$true] %s55_s12  ;;  %s80_s14 = int_to_ptr.vmem [resolvable:$true] %s79_s14 }
  0x27   :  { %s3198_s15 = scalar_lea.vmem %s56_s12, 2048  ;;  %p3203_p2 = scmp.lt.s32.totalorder %s56_s12, %s56_s12 }
  0x28   :  { %p3199_p1 = scmp.ne.s32.totalorder %s56_s12, %s3198_s15  ;;  %p3204_p3 = scmp.lt.s32.totalorder %s3198_s15, %s3198_s15 }
  0x2a   :  { %p3205_p4 = por %p3204_p3, %p3203_p2 }
  0x2c   :  { %p3206_p5 = pnand %p3205_p4, %p3199_p1 }
  0x2e   :  { %3209 = shalt.err (!%p3206_p5)
}
  0x2f   :  { %61 = dma.hbm_to_vmem [thread:$0]  %s4328_s5, 2048, %s56_s12, [#allocation7], %s3285_s25, %s3285_s25, %s3286_s26  }
  0x30   :  { %s3218_s2 = scalar_lea.vmem %s80_s14, 2048  ;;  %p3223_p7 = scmp.lt.s32.totalorder %s80_s14, %s80_s14 }
  0x31   :  { %p3219_p6 = scmp.ne.s32.totalorder %s80_s14, %s3218_s2  ;;  %p3224_p8 = scmp.lt.s32.totalorder %s3218_s2, %s3218_s2 }
  0x33   :  { %p3225_p9 = por %p3224_p8, %p3223_p7 }
  0x35   :  { %p3226_p10 = pnand %p3225_p9, %p3219_p6 }
  0x37   :  { %3229 = shalt.err (!%p3226_p10)
}
  0x38   :  { %85 = dma.hbm_to_vmem [thread:$0]  %s4330_s7, 2048, %s80_s14, [#allocation10], %s3285_s25, %s3285_s25, %s3286_s26  }
  0x39   :  { %s3289_s19 = smov [#allocation12]  }
  0x3a   :  { %s91_s20 = sshll.u32 %s3289_s19, 4  ;;  %s92_s20 = int_to_ptr.vmem [resolvable:$true] %s91_s20 }
  0x3b   :  { %s3238_s21 = scalar_lea.vmem %s92_s20, 2048  ;;  %p3243_p12 = scmp.lt.s32.totalorder %s92_s20, %s92_s20 }
  0x3c   :  { %p3239_p11 = scmp.ne.s32.totalorder %s92_s20, %s3238_s21  ;;  %p3244_p13 = scmp.lt.s32.totalorder %s3238_s21, %s3238_s21 }
  0x3e   :  { %p3245_p0 = por %p3244_p13, %p3243_p12 }
  0x40   :  { %p3246_p1 = pnand %p3245_p0, %p3239_p11 }
  0x42   :  { %3249 = shalt.err (!%p3246_p1)
}
  0x43   :  { %97 = dma.hbm_to_vmem [thread:$0]  %s4331_s8, 2048, %s92_s20, [#allocation13], %s3285_s25, %s3285_s25, %s3286_s26  }
  0x44   :  { %3270 = dma.done.wait [#allocation4], 1024  }
  0x45   :  { %3271 = vsyncadd [#allocation4], 4294966272 }
  0x46   :  { %3272 = dma.done.wait [#allocation7], 3072  }
  0x47   :  { %3273 = vsyncadd [#allocation7], 4294964224 }
  0x48   :  { %3274 = dma.done.wait [#allocation10], 4096  }
  0x49   :  { %3275 = vsyncadd [#allocation10], 4294963200 }
  0x4a   :  { %3276 = dma.done.wait [#allocation13], 2048  }
  0x4b   :  { %3277 = vsyncadd [#allocation13], 4294965248  ;;  %v3290_v0 = vmov 0   ;;  %v156_v1 = vld [vmem:[#allocation8 + $0x78] sm:$0xff]  ;;  %v155_v2 = vld [vmem:[#allocation8 + $0x70] sm:$0xff] }
  0x4c   :  { %3107 = vset.pattern.permute.xlu0 %v3290_v0  ;;  %3108 = vset.pattern.permute.xlu1 %v3290_v0  ;;  %v154_v3 = vld [vmem:[#allocation8 + $0x68] sm:$0xff]  ;;  %v153_v4 = vld [vmem:[#allocation8 + $0x60] sm:$0xff]  ;;  %v152_v6 = vld [vmem:[#allocation8 + $0x58] sm:$0xff] }
  0x4d   :  { %2695 = vmatprep.subr.mxu1 %v156_v1  ;;  %v125_v5 = vld [vmem:[%s4323_s0] sm:$0xff]  ;;  %v151_v7 = vld [vmem:[#allocation8 + $0x50] sm:$0xff]  ;;  %v150_v8 = vld [vmem:[#allocation8 + $0x48] sm:$0xff] }
  0x4e   :  { %2696 = vmatpush3.msra.mxu1 %v156_v1  ;;  %2727 = vmatprep.mubr.f32.mxu1 %v125_v5  ;;  %v149_v9 = vld [vmem:[#allocation8 + $0x40] sm:$0xff]  ;;  %v148_v10 = vld [vmem:[#allocation8 + $0x38] sm:$0xff]  ;;  %v147_v11 = vld [vmem:[#allocation8 + $0x30] sm:$0xff] }
  0x4f   :  { %2697 = vmatprep.subr.mxu1 %v155_v2  ;;  %v146_v12 = vld [vmem:[#allocation8 + $0x28] sm:$0xff]  ;;  %v145_v13 = vld [vmem:[#allocation8 + $0x20] sm:$0xff]  ;;  %v553_v15 = vld [vmem:[%s4327_s4 + $0x10] sm:$0xff] }
  0x50   :  { %2698 = vmatpush3.msra.mxu1 %v155_v2  ;;  %v551_v14 = vld [vmem:[%s4327_s4] sm:$0xff]  ;;  %v144_v16 = vld [vmem:[#allocation8 + $0x18] sm:$0xff]  ;;  %1029 = vperm.xlu1 %3108, %v553_v15   ;;  %v552_v17 = vld [vmem:[%s4327_s4 + $0x8] sm:$0xff] }
  0x51   :  { %2699 = vmatprep.subr.mxu1 %v154_v3  ;;  %1019 = vperm.xlu0 %3107, %v551_v14   ;;  %v143_v18 = vld [vmem:[#allocation8 + $0x10] sm:$0xff]  ;;  %v554_v19 = vld [vmem:[%s4327_s4 + $0x18] sm:$0xff]  ;;  %v142_v20 = vld [vmem:[#allocation8 + $0x8] sm:$0xff] }
  0x52   :  { %2700 = vmatpush3.msra.mxu1 %v154_v3  ;;  %v555_v21 = vld [vmem:[%s4327_s4 + $0x20] sm:$0xff]  ;;  %v556_v23 = vld [vmem:[%s4327_s4 + $0x28] sm:$0xff]  ;;  %v353_v25 = vld [vmem:[#allocation9 + $0x78] sm:$0xff] }
  0x53   :  { %2701 = vmatprep.subr.mxu1 %v153_v4  ;;  %v141_v22 = vld [vmem:[#allocation8] sm:$0xff]  ;;  %v126_v24 = vld [vmem:[%s4323_s0 + $0x8] sm:$0xff]  ;;  %v352_v26 = vld [vmem:[#allocation9 + $0x70] sm:$0xff] }
  0x54   :  { %2702 = vmatpush3.msra.mxu1 %v153_v4  ;;  %1034 = vperm.xlu1 %3108, %v554_v19   ;;  %v127_v27 = vld [vmem:[%s4323_s0 + $0x10] sm:$0xff]  ;;  %v558_v28 = vld [vmem:[%s4327_s4 + $0x38] sm:$0xff]  ;;  %v351_v31 = vld [vmem:[#allocation9 + $0x68] sm:$0xff] }
  0x55   :  { %2703 = vmatprep.subr.mxu1 %v152_v6  ;;  %1024 = vperm.xlu0 %3107, %v552_v17   ;;  %v557_v29 = vld [vmem:[%s4327_s4 + $0x30] sm:$0xff]  ;;  %v128_v30 = vld [vmem:[%s4323_s0 + $0x18] sm:$0xff]  ;;  %v129_v32 = vld [vmem:[%s4323_s0 + $0x20] sm:$0xff] }
  0x56   :  { %2704 = vmatpush3.msra.mxu1 %v152_v6  ;;  %v350_v33 = vld [vmem:[#allocation9 + $0x60] sm:$0xff]  ;;  %v560_v34 = vld [vmem:[%s4327_s4 + $0x48] sm:$0xff]  ;;  %v349_v37 = vld [vmem:[#allocation9 + $0x58] sm:$0xff] }
  0x57   :  { %2705 = vmatprep.subr.mxu1 %v151_v7  ;;  %v559_v35 = vld [vmem:[%s4327_s4 + $0x40] sm:$0xff]  ;;  %v130_v36 = vld [vmem:[%s4323_s0 + $0x28] sm:$0xff]  ;;  %v131_v38 = vld [vmem:[%s4323_s0 + $0x30] sm:$0xff] }
  0x58   :  { %2706 = vmatpush3.msra.mxu1 %v151_v7  ;;  %1044 = vperm.xlu1 %3108, %v556_v23   ;;  %v348_v39 = vld [vmem:[#allocation9 + $0x50] sm:$0xff]  ;;  %v562_v40 = vld [vmem:[%s4327_s4 + $0x58] sm:$0xff]  ;;  %v347_v43 = vld [vmem:[#allocation9 + $0x48] sm:$0xff] }
  0x59   :  { %2707 = vmatprep.subr.mxu1 %v150_v8  ;;  %1039 = vperm.xlu0 %3107, %v555_v21   ;;  %v561_v41 = vld [vmem:[%s4327_s4 + $0x50] sm:$0xff]  ;;  %v132_v42 = vld [vmem:[%s4323_s0 + $0x38] sm:$0xff]  ;;  %v133_v44 = vld [vmem:[%s4323_s0 + $0x40] sm:$0xff] }
  0x5a   :  { %2708 = vmatpush3.msra.mxu1 %v150_v8  ;;  %v346_v45 = vld [vmem:[#allocation9 + $0x40] sm:$0xff]  ;;  %v564_v46 = vld [vmem:[%s4327_s4 + $0x68] sm:$0xff]  ;;  %v345_v49 = vld [vmem:[#allocation9 + $0x38] sm:$0xff] }
  0x5b   :  { %2709 = vmatprep.subr.mxu1 %v149_v9  ;;  %v563_v47 = vld [vmem:[%s4327_s4 + $0x60] sm:$0xff]  ;;  %v134_v48 = vld [vmem:[%s4323_s0 + $0x48] sm:$0xff]  ;;  %v135_v50 = vld [vmem:[%s4323_s0 + $0x50] sm:$0xff] }
  0x5c   :  { %2710 = vmatpush3.msra.mxu1 %v149_v9  ;;  %1054 = vperm.xlu1 %3108, %v558_v28   ;;  %v344_v51 = vld [vmem:[#allocation9 + $0x30] sm:$0xff]  ;;  %v566_v52 = vld [vmem:[%s4327_s4 + $0x78] sm:$0xff]  ;;  %v343_v55 = vld [vmem:[#allocation9 + $0x28] sm:$0xff] }
  0x5d   :  { %2711 = vmatprep.subr.mxu1 %v148_v10  ;;  %1049 = vperm.xlu0 %3107, %v557_v29   ;;  %v565_v53 = vld [vmem:[%s4327_s4 + $0x70] sm:$0xff]  ;;  %v136_v54 = vld [vmem:[%s4323_s0 + $0x58] sm:$0xff]  ;;  %v137_v56 = vld [vmem:[%s4323_s0 + $0x60] sm:$0xff] }
  0x5e   :  { %2712 = vmatpush3.msra.mxu1 %v148_v10  ;;  %v342_v57 = vld [vmem:[#allocation9 + $0x20] sm:$0xff]  ;;  %v568_v58 = vld [vmem:[%s4327_s4 + $0x88] sm:$0xff]  ;;  %v341_v61 = vld [vmem:[#allocation9 + $0x18] sm:$0xff] }
  0x5f   :  { %2713 = vmatprep.subr.mxu1 %v147_v11  ;;  %v567_v59 = vld [vmem:[%s4327_s4 + $0x80] sm:$0xff]  ;;  %v138_v60 = vld [vmem:[%s4323_s0 + $0x68] sm:$0xff]  ;;  %v139_v62 = vld [vmem:[%s4323_s0 + $0x70] sm:$0xff] }
  0x60   :  { %2714 = vmatpush3.msra.mxu1 %v147_v11  ;;  %1064 = vperm.xlu1 %3108, %v560_v34   ;;  %v340_v63 = vld [vmem:[#allocation9 + $0x10] sm:$0xff]  ;;  %v570_v0 = vld [vmem:[%s4327_s4 + $0x98] sm:$0xff]  ;;  %v339_v3 = vld [vmem:[#allocation9 + $0x8] sm:$0xff] }
  0x61   :  { %2715 = vmatprep.subr.mxu1 %v146_v12  ;;  %1059 = vperm.xlu0 %3107, %v559_v35   ;;  %v569_v1 = vld [vmem:[%s4327_s4 + $0x90] sm:$0xff]  ;;  %v140_v2 = vld [vmem:[%s4323_s0 + $0x78] sm:$0xff]  ;;  %v322_v4 = vld [vmem:[%s4324_s1] sm:$0xff] }
  0x62   :  { %2716 = vmatpush3.msra.mxu1 %v146_v12  ;;  %v338_v5 = vld [vmem:[#allocation9] sm:$0xff]  ;;  %v572_v6 = vld [vmem:[%s4327_s4 + $0xa8] sm:$0xff]  ;;  %v324_v9 = vld [vmem:[%s4324_s1 + $0x10] sm:$0xff] }
  0x63   :  { %2717 = vmatprep.subr.mxu1 %v145_v13  ;;  %v571_v7 = vld [vmem:[%s4327_s4 + $0xa0] sm:$0xff]  ;;  %v323_v8 = vld [vmem:[%s4324_s1 + $0x8] sm:$0xff]  ;;  %v574_v10 = vld [vmem:[%s4327_s4 + $0xb8] sm:$0xff] }
  0x64   :  { %2718 = vmatpush3.msra.mxu1 %v145_v13  ;;  %1074 = vperm.xlu1 %3108, %v562_v40   ;;  %v573_v11 = vld [vmem:[%s4327_s4 + $0xb0] sm:$0xff]  ;;  %v325_v12 = vld [vmem:[%s4324_s1 + $0x18] sm:$0xff]  ;;  %v326_v13 = vld [vmem:[%s4324_s1 + $0x20] sm:$0xff] }
  0x65   :  { %2719 = vmatprep.subr.mxu1 %v144_v16  ;;  %1069 = vperm.xlu0 %3107, %v561_v41   ;;  %v576_v14 = vld [vmem:[%s4327_s4 + $0xc8] sm:$0xff]  ;;  %v575_v15 = vld [vmem:[%s4327_s4 + $0xc0] sm:$0xff]  ;;  %v328_v17 = vld [vmem:[%s4324_s1 + $0x30] sm:$0xff] }
  0x66   :  { %2720 = vmatpush3.msra.mxu1 %v144_v16  ;;  %v327_v16 = vld [vmem:[%s4324_s1 + $0x28] sm:$0xff]  ;;  %v577_v19 = vld [vmem:[%s4327_s4 + $0xd0] sm:$0xff]  ;;  %v330_v21 = vld [vmem:[%s4324_s1 + $0x40] sm:$0xff] }
  0x67   :  { %2721 = vmatprep.subr.mxu1 %v143_v18  ;;  %v579_v23 = vld [vmem:[%s4327_s4 + $0xe0] sm:$0xff]  ;;  %v333_v28 = vld [vmem:[%s4324_s1 + $0x58] sm:$0xff] }
  0x68   :  { %2722 = vmatpush3.msra.mxu1 %v143_v18  ;;  %1084 = vperm.xlu1 %3108, %v564_v46   ;;  %v578_v18 = vld [vmem:[%s4327_s4 + $0xd8] sm:$0xff]  ;;  %v334_v29 = vld [vmem:[%s4324_s1 + $0x60] sm:$0xff] }
  0x69   :  { %2723 = vmatprep.subr.mxu1 %v142_v20  ;;  %1079 = vperm.xlu0 %3107, %v563_v47   ;;  %v3569_v34 = vld [vmem:[#allocation3] sm:$0xff]  }
  0x6a   :  { %2724 = vmatpush3.msra.mxu1 %v142_v20  ;;  %v329_v20 = vld [vmem:[%s4324_s1 + $0x38] sm:$0xff]  ;;  %2823 = vmatprep.mubr.bf16.mxu0 %v3569_v34 }
  0x6b   :  { %2725 = vmatprep.subr.mxu1 %v141_v22 }
  0x6c   :  { %2726 = vmatpush3.msra.mxu1 %v141_v22  ;;  %1094 = vperm.xlu1 %3108, %v566_v52   ;;  %v580_v22 = vld [vmem:[%s4327_s4 + $0xe8] sm:$0xff] }
  0x6d   :  { %2728 = vmatmul.mubr.f32.vlgmr.msra.gmra.mxu1 %v126_v24  ;;  %2751 = vmatprep.subr.mxu1 %v353_v25  ;;  %v331_v24 = vld [vmem:[%s4324_s1 + $0x48] sm:$0xff] }
  0x6e   :  { %2752 = vmatpush3.msra.mxu1 %v353_v25  ;;  %2730 = vmatprep.mubr.f32.mxu1 %v127_v27  ;;  %v332_v25 = vld [vmem:[%s4324_s1 + $0x50] sm:$0xff] }
  0x6f   :  { %2753 = vmatprep.subr.mxu1 %v352_v26  ;;  %1089 = vperm.xlu0 %3107, %v565_v53   ;;  %v581_v27 = vld [vmem:[%s4327_s4 + $0xf0] sm:$0xff] }
  0x70   :  { %2754 = vmatpush3.msra.mxu1 %v352_v26  ;;  %1104 = vperm.xlu1 %3108, %v568_v58   ;;  %v582_v26 = vld [vmem:[%s4327_s4 + $0xf8] sm:$0xff] }
  0x71   :  { %2731 = vmatmul.mubr.f32.gmra.mxu1 %v128_v30  ;;  %2755 = vmatprep.subr.mxu1 %v351_v31  ;;  %v335_v30 = vld [vmem:[%s4324_s1 + $0x68] sm:$0xff] }
  0x72   :  { %2756 = vmatpush3.msra.mxu1 %v351_v31  ;;  %2733 = vmatprep.mubr.f32.mxu1 %v129_v32  ;;  %v336_v31 = vld [vmem:[%s4324_s1 + $0x70] sm:$0xff]  ;;  %v337_v32 = vld [vmem:[%s4324_s1 + $0x78] sm:$0xff] }
  0x73   :  { %2757 = vmatprep.subr.mxu1 %v350_v33  ;;  %1099 = vperm.xlu0 %3107, %v567_v59  }
  0x74   :  { %2758 = vmatpush3.msra.mxu1 %v350_v33  ;;  %1114 = vperm.xlu1 %3108, %v570_v0   ;;  %v3109_v33 = vld [vmem:[#allocation6] sm:$0xff]  }
  0x75   :  { %2734 = vmatmul.mubr.f32.gmra.mxu1 %v130_v36  ;;  %2759 = vmatprep.subr.mxu1 %v349_v37 }
  0x76   :  { %2760 = vmatpush3.msra.mxu1 %v349_v37  ;;  %2736 = vmatprep.mubr.f32.mxu1 %v131_v38 }
  0x77   :  { %2761 = vmatprep.subr.mxu1 %v348_v39  ;;  %1109 = vperm.xlu0 %3107, %v569_v1  }
  0x78   :  { %2762 = vmatpush3.msra.mxu1 %v348_v39  ;;  %1124 = vperm.xlu1 %3108, %v572_v6  }
  0x79   :  { %2737 = vmatmul.mubr.f32.gmra.mxu1 %v132_v42  ;;  %2763 = vmatprep.subr.mxu1 %v347_v43 }
  0x7a   :  { %2764 = vmatpush3.msra.mxu1 %v347_v43  ;;  %2739 = vmatprep.mubr.f32.mxu1 %v133_v44 }
  0x7b   :  { %2765 = vmatprep.subr.mxu1 %v346_v45  ;;  %1119 = vperm.xlu0 %3107, %v571_v7  }
  0x7c   :  { %2766 = vmatpush3.msra.mxu1 %v346_v45  ;;  %1134 = vperm.xlu1 %3108, %v574_v10  }
  0x7d   :  { %2740 = vmatmul.mubr.f32.gmra.mxu1 %v134_v48  ;;  %2767 = vmatprep.subr.mxu1 %v345_v49 }
  0x7e   :  { %2768 = vmatpush3.msra.mxu1 %v345_v49  ;;  %2742 = vmatprep.mubr.f32.mxu1 %v135_v50  ;;  %v2449_v50 = vld [vmem:[%s4332_s9] ss:$0 sm:$0xff] }
  0x7f   :  { %2769 = vmatprep.subr.mxu1 %v344_v51  ;;  %1129 = vperm.xlu0 %3107, %v573_v11  }
  0x80   :  { %2770 = vmatpush3.msra.mxu1 %v344_v51  ;;  %1144 = vperm.xlu1 %3108, %v576_v14  }
  0x81   :  { %2743 = vmatmul.mubr.f32.gmra.mxu1 %v136_v54  ;;  %2771 = vmatprep.subr.mxu1 %v343_v55 }
  0x82   :  { %2772 = vmatpush3.msra.mxu1 %v343_v55  ;;  %2745 = vmatprep.mubr.f32.mxu1 %v137_v56 }
  0x83   :  { %2773 = vmatprep.subr.mxu1 %v342_v57  ;;  %1139 = vperm.xlu0 %3107, %v575_v15  }
  0x84   :  { %2774 = vmatpush3.msra.mxu1 %v342_v57  ;;  %1154 = vperm.xlu1 %3108, %v578_v18  }
  0x85   :  { %2746 = vmatmul.mubr.f32.gmra.mxu1 %v138_v60  ;;  %2775 = vmatprep.subr.mxu1 %v341_v61 }
  0x86   :  { %2776 = vmatpush3.msra.mxu1 %v341_v61  ;;  %2748 = vmatprep.mubr.f32.mxu1 %v139_v62 }
  0x87   :  { %2777 = vmatprep.subr.mxu1 %v340_v63  ;;  %1149 = vperm.xlu0 %3107, %v577_v19  }
  0x88   :  { %2778 = vmatpush3.msra.mxu1 %v340_v63  ;;  %1164 = vperm.xlu1 %3108, %v580_v22  }
  0x89   :  { %2749 = vmatmul.mubr.f32.gmra.mxu1 %v140_v2  ;;  %2779 = vmatprep.subr.mxu1 %v339_v3 }
  0x8a   :  { %2780 = vmatpush3.msra.mxu1 %v339_v3  ;;  %2783 = vmatprep.mubr.f32.mxu1 %v322_v4 }
  0x8b   :  { %2781 = vmatprep.subr.mxu1 %v338_v5  ;;  %1159 = vperm.xlu0 %3107, %v579_v23  }
  0x8c   :  { %2782 = vmatpush3.msra.mxu1 %v338_v5  ;;  %1174 = vperm.xlu1 %3108, %v582_v26  }
  0x8d   :  { %2784 = vmatmul.mubr.f32.vlgmr.msra.gmra.mxu1 %v323_v8 }
  0x8e   :  { %2786 = vmatprep.mubr.f32.mxu1 %v324_v9 }
  0x8f   :  { %1169 = vperm.xlu0 %3107, %v581_v27   ;;  %v2450_v27 = vld [vmem:[%s4332_s9 + $0x1] ss:$0 sm:$0xff] }
  0x91   :  { %2787 = vmatmul.mubr.f32.gmra.mxu1 %v325_v12 }
  0x92   :  { %2789 = vmatprep.mubr.f32.mxu1 %v326_v13 }
  0x95   :  { %2790 = vmatmul.mubr.f32.gmra.mxu1 %v327_v16 }
  0x96   :  { %2792 = vmatprep.mubr.f32.mxu1 %v328_v17 }
  0x99   :  { %2793 = vmatmul.mubr.f32.gmra.mxu1 %v329_v20 }
  0x9a   :  { %2795 = vmatprep.mubr.f32.mxu1 %v330_v21 }
  0x9d   :  { %2796 = vmatmul.mubr.f32.gmra.mxu1 %v331_v24 }
  0x9e   :  { %2798 = vmatprep.mubr.f32.mxu1 %v332_v25 }
  0xa1   :  { %2799 = vmatmul.mubr.f32.gmra.mxu1 %v333_v28 }
  0xa2   :  { %2801 = vmatprep.mubr.f32.mxu1 %v334_v29 }
  0xa5   :  { %2802 = vmatmul.mubr.f32.gmra.mxu1 %v335_v30 }
  0xa6   :  { %2804 = vmatprep.mubr.f32.mxu1 %v336_v31 }
  0xa9   :  { %2805 = vmatmul.mubr.f32.gmra.mxu1 %v337_v32  ;;  %v3110_v32 = vld [vmem:[#allocation6 + $0x8] sm:$0xff]  }
  0xaa   :  { %2855 = vmatprep.mubr.bf16.mxu1 %v3109_v33  ;;  %v3111_v33 = vld [vmem:[#allocation6 + $0x10] sm:$0xff]  }
 0x12d   :  { %v3572_v35 = vpop.f32.mrf.mxu1 }
 0x12e   :  { %v3634_v23 = vadd.f32 %v3572_v35, %v2449_v50 }
 0x12f   :  { %v227_v36 = vpop.f32.mrf.mxu1 }
 0x130   :  { %v3629_v20 = vadd.f32 %v2449_v50, %v227_v36  ;;  %4396 = vst [vmem:[#allocation30_spill] sm:$0xff] %v3634_v23 }
 0x131   :  { %v2732_v37 = vpop.f32.mrf.mxu1 }
 0x132   :  { %v3627_v18 = vadd.f32 %v2732_v37, %v2449_v50  ;;  %4395 = vst [vmem:[#allocation29_spill] sm:$0xff] %v3629_v20  ;;  %v599_v25 = vpack.c.bf16 %v3634_v23, %v3629_v20 }
 0x133   :  { %v237_v38 = vpop.f32.mrf.mxu1 }
 0x134   :  { %v3623_v15 = vadd.f32 %v2449_v50, %v237_v38  ;;  %4394 = vst [vmem:[#allocation28_spill] sm:$0xff] %v3627_v18 }
 0x135   :  { %v2735_v39 = vpop.f32.mrf.mxu1 }
 0x136   :  { %v3621_v13 = vadd.f32 %v2735_v39, %v2449_v50  ;;  %4393 = vst [vmem:[#allocation27_spill] sm:$0xff] %v3623_v15  ;;  %v600_v21 = vpack.c.bf16 %v3627_v18, %v3623_v15 }
 0x137   :  { %v247_v40 = vpop.f32.mrf.mxu1 }
 0x138   :  { %v3617_v10 = vadd.f32 %v2449_v50, %v247_v40  ;;  %4392 = vst [vmem:[#allocation26_spill] sm:$0xff] %v3621_v13 }
 0x139   :  { %v2738_v41 = vpop.f32.mrf.mxu1 }
 0x13a   :  { %v3615_v8 = vadd.f32 %v2738_v41, %v2449_v50  ;;  %4391 = vst [vmem:[#allocation25_spill] sm:$0xff] %v3617_v10  ;;  %v601_v16 = vpack.c.bf16 %v3621_v13, %v3617_v10 }
 0x13b   :  { %v257_v42 = vpop.f32.mrf.mxu1 }
 0x13c   :  { %v3611_v5 = vadd.f32 %v2449_v50, %v257_v42  ;;  %4390 = vst [vmem:[#allocation24_spill] sm:$0xff] %v3615_v8  ;;  %v3112_v42 = vld [vmem:[#allocation6 + $0x18] sm:$0xff]  }
 0x13d   :  { %v2741_v43 = vpop.f32.mrf.mxu1 }
 0x13e   :  { %v3607_v3 = vadd.f32 %v2741_v43, %v2449_v50  ;;  %4389 = vst [vmem:[#allocation23_spill] sm:$0xff] %v3611_v5  ;;  %v602_v11 = vpack.c.bf16 %v3615_v8, %v3611_v5  ;;  %v3113_v43 = vld [vmem:[#allocation6 + $0x20] sm:$0xff]  }
 0x13f   :  { %v267_v44 = vpop.f32.mrf.mxu1 }
 0x140   :  { %v3601_v0 = vadd.f32 %v2449_v50, %v267_v44  ;;  %4388 = vst [vmem:[#allocation22_spill] sm:$0xff] %v3607_v3 }
 0x141   :  { %v2744_v45 = vpop.f32.mrf.mxu1 }
 0x142   :  { %v3597_v62 = vadd.f32 %v2744_v45, %v2449_v50  ;;  %4387 = vst [vmem:[#allocation21_spill] sm:$0xff] %v3601_v0  ;;  %v603_v6 = vpack.c.bf16 %v3607_v3, %v3601_v0 }
 0x143   :  { %v277_v46 = vpop.f32.mrf.mxu1 }
 0x144   :  { %v3591_v59 = vadd.f32 %v2449_v50, %v277_v46  ;;  %4386 = vst [vmem:[#allocation20_spill] sm:$0xff] %v3597_v62 }
 0x145   :  { %v2747_v47 = vpop.f32.mrf.mxu1 }
 0x146   :  { %v3585_v56 = vadd.f32 %v2747_v47, %v2449_v50  ;;  %v604_v1 = vpack.c.bf16 %v3597_v62, %v3591_v59 }
 0x147   :  { %v287_v48 = vpop.f32.mrf.mxu1 }
 0x148   :  { %v3577_v52 = vadd.f32 %v2449_v50, %v287_v48 }
 0x149   :  { %v2750_v49 = vpop.f32.mrf.mxu1 }
 0x14a   :  { %v3579_v53 = vadd.f32 %v2750_v49, %v2449_v50  ;;  %v605_v60 = vpack.c.bf16 %v3585_v56, %v3577_v52 }
 0x14b   :  { %v297_v51 = vpop.f32.mrf.mxu1 }
 0x14c   :  { %v3581_v54 = vadd.f32 %v2449_v50, %v297_v51  ;;  %v3674_v50 = vld [vmem:[#allocation6 + $0x28] sm:$0xff]   ;;  %v3676_v51 = vld [vmem:[#allocation6 + $0x30] sm:$0xff]  }
 0x14d   :  { %v3583_v55 = vpop.f32.mrf.mxu1  ;;  %4397 = vst [vmem:[#allocation31_spill] sm:$0xff] %v3674_v50  ;;  %4398 = vst [vmem:[#allocation32_spill] sm:$0xff] %v3676_v51 }
 0x14e   :  { %v606_v57 = vpack.c.bf16 %v3579_v53, %v3581_v54 }
 0x14f   :  { %v3589_v58 = vpop.f32.mrf.mxu1 }
 0x150   :  { %2839 = vmatprep.subr.bf16.mxu1 %v606_v57 }
 0x151   :  { %v3595_v61 = vpop.f32.mrf.mxu1  ;;  %2840 = vmatpush3.bf16.msra.mxu1 %v606_v57 }
 0x152   :  { %2841 = vmatprep.subr.bf16.mxu1 %v605_v60 }
 0x153   :  { %v3599_v63 = vpop.f32.mrf.mxu1 }
 0x155   :  { %v3605_v2 = vpop.f32.mrf.mxu1  ;;  %2842 = vmatpush3.bf16.msra.mxu1 %v605_v60  ;;  %v3682_v60 = vadd.f32 %v2450_v27, %v3599_v63  ;;  %v3696_v63 = vld [vmem:[#allocation6 + $0x38] sm:$0xff]  }
 0x156   :  { %2843 = vmatprep.subr.bf16.mxu1 %v604_v1  ;;  %v3679_v57 = vadd.f32 %v3605_v2, %v2450_v27  ;;  %4399 = vst [vmem:[#allocation33_spill] sm:$0xff] %v3696_v63 }
 0x157   :  { %v3609_v4 = vpop.f32.mrf.mxu1 }
 0x158   :  { %v3670_v48 = vadd.f32 %v2450_v27, %v3609_v4  ;;  %v3689_v4 = vadd.f32 %v3595_v61, %v2450_v27 }
 0x159   :  { %v2794_v7 = vpop.f32.mrf.mxu1  ;;  %2844 = vmatpush3.bf16.msra.mxu1 %v604_v1 }
 0x15a   :  { %2845 = vmatprep.subr.bf16.mxu1 %v603_v6  ;;  %v3667_v47 = vadd.f32 %v2794_v7, %v2450_v27  ;;  %v625_v1 = vpack.c.bf16 %v3679_v57, %v3670_v48  ;;  %v624_v2 = vpack.c.bf16 %v3689_v4, %v3682_v60  ;;  %v3699_v7 = vadd.f32 %v3583_v55, %v2450_v27  ;;  %v3711_v55 = vld [vmem:[#allocation3 + $0x18] sm:$0xff]  }
 0x15b   :  { %v454_v9 = vpop.f32.mrf.mxu1  ;;  %4401 = vst [vmem:[#allocation35_spill] sm:$0xff] %v3711_v55 }
 0x15c   :  { %v3663_v45 = vadd.f32 %v2450_v27, %v454_v9  ;;  %v3707_v9 = vld [vmem:[#allocation3 + $0x10] sm:$0xff]  }
 0x15d   :  { %v2797_v12 = vpop.f32.mrf.mxu1  ;;  %2846 = vmatpush3.bf16.msra.mxu1 %v603_v6  ;;  %v3692_v6 = vadd.f32 %v2450_v27, %v3589_v58  ;;  %v3705_v58 = vld [vmem:[#allocation3 + $0x8] sm:$0xff]   ;;  %4400 = vst [vmem:[#allocation34_spill] sm:$0xff] %v3707_v9 }
 0x15e   :  { %2847 = vmatprep.subr.bf16.mxu1 %v602_v11  ;;  %v3661_v44 = vadd.f32 %v2797_v12, %v2450_v27  ;;  %v626_v49 = vpack.c.bf16 %v3667_v47, %v3663_v45  ;;  %v3717_v12 = vld [vmem:[#allocation3 + $0x28] sm:$0xff]  }
 0x15f   :  { %v464_v14 = vpop.f32.mrf.mxu1  ;;  %v623_v61 = vpack.c.bf16 %v3699_v7, %v3692_v6  ;;  %4403 = vst [vmem:[#allocation37_spill] sm:$0xff] %v3717_v12 }
 0x160   :  { %v3657_v40 = vadd.f32 %v2450_v27, %v464_v14  ;;  %v3723_v14 = vld [vmem:[#allocation3 + $0x38] sm:$0xff]  }
 0x161   :  { %v2800_v17 = vpop.f32.mrf.mxu1  ;;  %2848 = vmatpush3.bf16.msra.mxu1 %v602_v11  ;;  %v3713_v11 = vld [vmem:[#allocation3 + $0x20] sm:$0xff]   ;;  %4405 = vst [vmem:[#allocation39_spill] sm:$0xff] %v3723_v14 }
 0x162   :  { %2849 = vmatprep.subr.bf16.mxu1 %v601_v16  ;;  %v3655_v39 = vadd.f32 %v2800_v17, %v2450_v27  ;;  %v627_v46 = vpack.c.bf16 %v3661_v44, %v3657_v40  ;;  %4402 = vst [vmem:[#allocation36_spill] sm:$0xff] %v3713_v11  ;;  %v1255_v17 = vld [vmem:[#allocation11 + $0x70] sm:$0xff] }
 0x163   :  { %v474_v19 = vpop.f32.mrf.mxu1 }
 0x164   :  { %v3651_v37 = vadd.f32 %v2450_v27, %v474_v19  ;;  %v1254_v19 = vld [vmem:[#allocation11 + $0x68] sm:$0xff] }
 0x165   :  { %v2803_v22 = vpop.f32.mrf.mxu1  ;;  %2850 = vmatpush3.bf16.msra.mxu1 %v601_v16  ;;  %v1256_v16 = vld [vmem:[#allocation11 + $0x78] sm:$0xff] }
 0x166   :  { %2851 = vmatprep.subr.bf16.mxu1 %v600_v21  ;;  %v3647_v35 = vadd.f32 %v2803_v22, %v2450_v27  ;;  %v628_v41 = vpack.c.bf16 %v3655_v39, %v3651_v37  ;;  %v1252_v22 = vld [vmem:[#allocation11 + $0x58] sm:$0xff] }
 0x167   :  { %v484_v24 = vpop.f32.mrf.mxu1 }
 0x168   :  { %v3641_v29 = vadd.f32 %v2450_v27, %v484_v24  ;;  %v1251_v24 = vld [vmem:[#allocation11 + $0x50] sm:$0xff] }
 0x169   :  { %v2806_v26 = vpop.f32.mrf.mxu1  ;;  %2852 = vmatpush3.bf16.msra.mxu1 %v600_v21  ;;  %v1253_v21 = vld [vmem:[#allocation11 + $0x60] sm:$0xff] }
 0x16a   :  { %2853 = vmatprep.subr.bf16.mxu1 %v599_v25  ;;  %v3643_v30 = vadd.f32 %v2806_v26, %v2450_v27  ;;  %v629_v38 = vpack.c.bf16 %v3647_v35, %v3641_v29  ;;  %v1249_v26 = vld [vmem:[#allocation11 + $0x40] sm:$0xff] }
 0x16b   :  { %v494_v28 = vpop.f32.mrf.mxu1 }
 0x16c   :  { %v3645_v31 = vadd.f32 %v2450_v27, %v494_v28  ;;  %v1248_v27 = vld [vmem:[#allocation11 + $0x38] sm:$0xff]  ;;  %v1247_v28 = vld [vmem:[#allocation11 + $0x30] sm:$0xff] }
 0x16d   :  { %2854 = vmatpush3.bf16.msra.mxu1 %v599_v25  ;;  %v1250_v25 = vld [vmem:[#allocation11 + $0x48] sm:$0xff] }
 0x16e   :  { %v630_v36 = vpack.c.bf16 %v3643_v30, %v3645_v31 }
 0x170   :  { %2807 = vmatprep.subr.bf16.mxu0 %v630_v36  ;;  %2856 = vmatmul.mubr.bf16.vlgmr.msra.gmra.mxu1 %v3110_v32  ;;  %v1246_v32 = vld [vmem:[#allocation11 + $0x28] sm:$0xff] }
 0x171   :  { %2808 = vmatpush3.bf16.msra.mxu0 %v630_v36  ;;  %2859 = vmatprep.mubr.bf16.mxu1 %v3111_v33  ;;  %v1245_v33 = vld [vmem:[#allocation11 + $0x20] sm:$0xff]  ;;  %v1244_v36 = vld [vmem:[#allocation11 + $0x18] sm:$0xff] }
 0x172   :  { %2809 = vmatprep.subr.bf16.mxu0 %v629_v38 }
 0x175   :  { %2810 = vmatpush3.bf16.msra.mxu0 %v629_v38  ;;  %v1243_v38 = vld [vmem:[#allocation11 + $0x10] sm:$0xff] }
 0x176   :  { %2811 = vmatprep.subr.bf16.mxu0 %v628_v41 }
 0x178   :  { %2860 = vmatmul.mubr.bf16.gmra.mxu1 %v3112_v42  ;;  %v1241_v42 = vld [vmem:[#allocation11] sm:$0xff] }
 0x179   :  { %2812 = vmatpush3.bf16.msra.mxu0 %v628_v41  ;;  %2863 = vmatprep.mubr.bf16.mxu1 %v3113_v43  ;;  %v1242_v41 = vld [vmem:[#allocation11 + $0x8] sm:$0xff]  ;;  %v3726_v43 = vpop.permute.xlu0 %1019 }
 0x17a   :  { %2813 = vmatprep.subr.bf16.mxu0 %v627_v46  ;;  %4406 = vst [vmem:[#allocation40_spill] sm:$0xff] %v3726_v43 }
 0x17d   :  { %2814 = vmatpush3.bf16.msra.mxu0 %v627_v46  ;;  %v3728_v46 = vpop.permute.xlu1 %1029 }
 0x17e   :  { %2815 = vmatprep.subr.bf16.mxu0 %v626_v49  ;;  %4407 = vst [vmem:[#allocation41_spill] sm:$0xff] %v3728_v46 }
 0x180   :  { %2864 = vmatmul.mubr.bf16.gmra.mxu1 %v3674_v50 }
 0x181   :  { %2816 = vmatpush3.bf16.msra.mxu0 %v626_v49  ;;  %2867 = vmatprep.mubr.bf16.mxu1 %v3676_v51  ;;  %v3730_v49 = vpop.permute.xlu0 %1024 }
 0x182   :  { %2817 = vmatprep.subr.bf16.mxu0 %v625_v1  ;;  %4408 = vst [vmem:[#allocation42_spill] sm:$0xff] %v3730_v49 }
 0x185   :  { %2818 = vmatpush3.bf16.msra.mxu0 %v625_v1  ;;  %v3732_v1 = vpop.permute.xlu1 %1034 }
 0x186   :  { %2819 = vmatprep.subr.bf16.mxu0 %v624_v2  ;;  %4409 = vst [vmem:[#allocation43_spill] sm:$0xff] %v3732_v1 }
 0x188   :  { %2868 = vmatmul.mubr.bf16.gmra.mxu1 %v3696_v63 }
 0x189   :  { %2820 = vmatpush3.bf16.msra.mxu0 %v624_v2  ;;  %2967 = vmatprep.mubr.bf16.mxu1 %v3569_v34  ;;  %v3719_v34 = vld [vmem:[#allocation3 + $0x30] sm:$0xff]   ;;  %v3734_v2 = vpop.permute.xlu0 %1039 }
 0x18a   :  { %2821 = vmatprep.subr.bf16.mxu0 %v623_v61  ;;  %4404 = vst [vmem:[#allocation38_spill] sm:$0xff] %v3719_v34  ;;  %4410 = vst [vmem:[#allocation44_spill] sm:$0xff] %v3734_v2 }
 0x18d   :  { %2822 = vmatpush3.bf16.msra.mxu0 %v623_v61  ;;  %v3736_v61 = vpop.permute.xlu1 %1044 }
 0x18e   :  { %2871 = vmatprep.subr.mxu0 %v1256_v16  ;;  %4411 = vst [vmem:[#allocation45_spill] sm:$0xff] %v3736_v61 }
 0x190   :  { %2824 = vmatmul.mubr.bf16.vlgmr.msra.gmra.mxu0 %v3705_v58 }
 0x191   :  { %2827 = vmatprep.mubr.bf16.mxu0 %v3707_v9  ;;  %2872 = vmatpush3.msra.mxu0 %v1256_v16  ;;  %v3738_v16 = vpop.permute.xlu0 %1049 }
 0x192   :  { %2873 = vmatprep.subr.mxu0 %v1255_v17  ;;  %4412 = vst [vmem:[#allocation46_spill] sm:$0xff] %v3738_v16 }
 0x193   :  { %2874 = vmatpush3.msra.mxu0 %v1255_v17  ;;  %v3740_v17 = vpop.permute.xlu1 %1054 }
 0x194   :  { %2875 = vmatprep.subr.mxu0 %v1254_v19  ;;  %4413 = vst [vmem:[#allocation47_spill] sm:$0xff] %v3740_v17 }
 0x195   :  { %2876 = vmatpush3.msra.mxu0 %v1254_v19  ;;  %v3742_v19 = vpop.permute.xlu0 %1059 }
 0x196   :  { %2877 = vmatprep.subr.mxu0 %v1253_v21  ;;  %4414 = vst [vmem:[#allocation48_spill] sm:$0xff] %v3742_v19 }
 0x197   :  { %2878 = vmatpush3.msra.mxu0 %v1253_v21  ;;  %v3744_v21 = vpop.permute.xlu1 %1064 }
 0x198   :  { %2828 = vmatmul.mubr.bf16.gmra.mxu0 %v3711_v55  ;;  %2879 = vmatprep.subr.mxu0 %v1252_v22  ;;  %4415 = vst [vmem:[#allocation49_spill] sm:$0xff] %v3744_v21 }
 0x199   :  { %2831 = vmatprep.mubr.bf16.mxu0 %v3713_v11  ;;  %2880 = vmatpush3.msra.mxu0 %v1252_v22  ;;  %v3746_v22 = vpop.permute.xlu0 %1069 }
 0x19a   :  { %2881 = vmatprep.subr.mxu0 %v1251_v24  ;;  %4416 = vst [vmem:[#allocation50_spill] sm:$0xff] %v3746_v22 }
 0x19b   :  { %2882 = vmatpush3.msra.mxu0 %v1251_v24 }
 0x19c   :  { %2883 = vmatprep.subr.mxu0 %v1250_v25 }
 0x19d   :  { %2884 = vmatpush3.msra.mxu0 %v1250_v25 }
 0x19e   :  { %2885 = vmatprep.subr.mxu0 %v1249_v26 }
 0x19f   :  { %2886 = vmatpush3.msra.mxu0 %v1249_v26  ;;  %v1177_v26 = vmul.f32 %v3726_v43, %v3629_v20 }
 0x1a0   :  { %2832 = vmatmul.mubr.bf16.gmra.mxu0 %v3717_v12  ;;  %2887 = vmatprep.subr.mxu0 %v1248_v27 }
 0x1a1   :  { %2835 = vmatprep.mubr.bf16.mxu0 %v3719_v34  ;;  %2888 = vmatpush3.msra.mxu0 %v1248_v27  ;;  %v3752_v27 = vpop.permute.xlu1 %1074 }
 0x1a2   :  { %2889 = vmatprep.subr.mxu0 %v1247_v28  ;;  %4417 = vst [vmem:[#allocation51_spill] sm:$0xff] %v3752_v27 }
 0x1a3   :  { %2890 = vmatpush3.msra.mxu0 %v1247_v28 }
 0x1a4   :  { %2891 = vmatprep.subr.mxu0 %v1246_v32 }
 0x1a5   :  { %2892 = vmatpush3.msra.mxu0 %v1246_v32  ;;  %v3762_v51 = vpop.permute.xlu1 %1084 }
 0x1a6   :  { %2893 = vmatprep.subr.mxu0 %v1245_v33  ;;  %4419 = vst [vmem:[#allocation53_spill] sm:$0xff] %v3762_v51 }
 0x1a7   :  { %2894 = vmatpush3.msra.mxu0 %v1245_v33 }
 0x1a8   :  { %2836 = vmatmul.mubr.bf16.gmra.mxu0 %v3723_v14  ;;  %2895 = vmatprep.subr.mxu0 %v1244_v36 }
 0x1a9   :  { %2896 = vmatpush3.msra.mxu0 %v1244_v36 }
 0x1aa   :  { %2897 = vmatprep.subr.mxu0 %v1243_v38 }
 0x1ab   :  { %2898 = vmatpush3.msra.mxu0 %v1243_v38  ;;  %v1178_v38 = vmul.f32 %v3730_v49, %v3634_v23  ;;  %v1181_v49 = vmul.f32 %v3734_v2, %v3617_v10 }
 0x1ac   :  { %2899 = vmatprep.subr.mxu0 %v1242_v41 }
 0x1ad   :  { %2900 = vmatpush3.msra.mxu0 %v1242_v41  ;;  %v3758_v41 = vpop.permute.xlu0 %1079 }
 0x1ae   :  { %2901 = vmatprep.subr.mxu0 %v1241_v42  ;;  %4418 = vst [vmem:[#allocation52_spill] sm:$0xff] %v3758_v41 }
 0x1af   :  { %2902 = vmatpush3.msra.mxu0 %v1241_v42  ;;  %v1179_v42 = vmul.f32 %v3728_v46, %v3623_v15  ;;  %v2058_v15 = vld [vmem:[#allocation12 + $0x30] sm:$0xff] }
 0x230   :  { %v3748_v24 = vpop.f32.mrf.mxu1 }
 0x232   :  { %v3754_v33 = vpop.f32.mrf.mxu1 }
 0x234   :  { %v3764_v50 = vpop.f32.mrf.mxu1 }
 0x236   :  { %v3772_v34 = vpop.f32.mrf.mxu1 }
 0x250   :  { %v2825_v25 = vpop.f32.mrf.mxu0 }
 0x251   :  { %v1211_v14 = vadd.f32 %v2825_v25, %v1179_v42  ;;  %v1182_v25 = vmul.f32 %v3736_v61, %v3621_v13  ;;  %v1183_v42 = vmul.f32 %v3738_v16, %v3611_v5 }
 0x252   :  { %v713_v28 = vpop.f32.mrf.mxu0 }
 0x253   :  { %v1209_v32 = vadd.f32 %v1177_v26, %v713_v28  ;;  %v1180_v28 = vmul.f32 %v3732_v1, %v3627_v18 }
 0x254   :  { %v2826_v36 = vpop.f32.mrf.mxu0 }
 0x255   :  { %2903 = vmatprep.mubr.f32.mxu0 %v1209_v32  ;;  %v3770_v32 = vpop.permute.xlu0 %1089  ;;  %v1212_v46 = vadd.f32 %v2826_v36, %v1180_v28 }
 0x256   :  { %v716_v63 = vpop.f32.mrf.mxu0  ;;  %4420 = vst [vmem:[#allocation54_spill] sm:$0xff] %v3770_v32 }
 0x257   :  { %v1210_v43 = vadd.f32 %v1178_v38, %v716_v63  ;;  %v3776_v38 = vpop.permute.xlu1 %1094 }
 0x258   :  { %v2829_v26 = vpop.f32.mrf.mxu0  ;;  %4421 = vst [vmem:[#allocation55_spill] sm:$0xff] %v3776_v38 }
 0x259   :  { %2904 = vmatmul.mubr.f32.vlgmr.msra.gmra.mxu0 %v1210_v43  ;;  %v1215_v1 = vadd.f32 %v2829_v26, %v1183_v42  ;;  %v3786_v28 = vpop.permute.xlu0 %1099  ;;  %v1186_v26 = vmul.f32 %v3744_v21, %v3607_v3  ;;  %v1187_v42 = vmul.f32 %v3746_v22, %v3591_v59 }
 0x25a   :  { %v729_v23 = vpop.f32.mrf.mxu0  ;;  %2906 = vmatprep.mubr.f32.mxu0 %v1211_v14  ;;  %v3780_v14 = vpop.f32.mrf.mxu1  ;;  %4422 = vst [vmem:[#allocation56_spill] sm:$0xff] %v3786_v28 }
 0x25b   :  { %v1213_v20 = vadd.f32 %v1181_v49, %v729_v23  ;;  %v1184_v23 = vmul.f32 %v3740_v17, %v3615_v8  ;;  %v1185_v49 = vmul.f32 %v3742_v19, %v3601_v0  ;;  %v3788_v61 = vpop.permute.xlu1 %1104 }
 0x25c   :  { %v2830_v63 = vpop.f32.mrf.mxu0  ;;  %4423 = vst [vmem:[#allocation57_spill] sm:$0xff] %v3788_v61 }
 0x25d   :  { %2907 = vmatmul.mubr.f32.gmra.mxu0 %v1212_v46  ;;  %v1216_v16 = vadd.f32 %v2830_v63, %v1184_v23  ;;  %v3794_v19 = vpop.permute.xlu0 %1109  ;;  %v1188_v63 = vmul.f32 %v3752_v27, %v3597_v62  ;;  %v1189_v23 = vmul.f32 %v3758_v41, %v3577_v52 }
 0x25e   :  { %v732_v2 = vpop.f32.mrf.mxu0  ;;  %2909 = vmatprep.mubr.f32.mxu0 %v1213_v20  ;;  %4424 = vst [vmem:[#allocation58_spill] sm:$0xff] %v3794_v19 }
 0x25f   :  { %v1214_v43 = vadd.f32 %v1182_v25, %v732_v2  ;;  %v890_v2 = vpop.f32.mrf.mxu1 }
 0x260   :  { %v2833_v36 = vpop.f32.mrf.mxu0 }
 0x261   :  { %2910 = vmatmul.mubr.f32.gmra.mxu0 %v1214_v43  ;;  %v2862_v18 = vpop.f32.mrf.mxu1 }
 0x262   :  { %v745_v46 = vpop.f32.mrf.mxu0  ;;  %2912 = vmatprep.mubr.f32.mxu0 %v1215_v1  ;;  %v1219_v1 = vadd.f32 %v2833_v36, %v1187_v42  ;;  %v3804_v36 = vpop.permute.xlu0 %1119 }
 0x263   :  { %v1217_v20 = vadd.f32 %v1185_v49, %v745_v46  ;;  %v3800_v49 = vpop.permute.xlu1 %1114  ;;  %4426 = vst [vmem:[#allocation60_spill] sm:$0xff] %v3804_v36 }
 0x264   :  { %v2834_v25 = vpop.f32.mrf.mxu0  ;;  %4425 = vst [vmem:[#allocation59_spill] sm:$0xff] %v3800_v49 }
 0x265   :  { %2913 = vmatmul.mubr.f32.gmra.mxu0 %v1216_v16  ;;  %v1220_v46 = vadd.f32 %v2834_v25, %v1188_v63  ;;  %v1192_v25 = vmul.f32 %v3776_v38, %v3579_v53  ;;  %v1193_v63 = vmul.f32 %v3786_v28, %v3692_v6 }
 0x266   :  { %v748_v17 = vpop.f32.mrf.mxu0  ;;  %2915 = vmatprep.mubr.f32.mxu0 %v1217_v20  ;;  %v893_v20 = vpop.f32.mrf.mxu1 }
 0x267   :  { %v1218_v43 = vadd.f32 %v1186_v26, %v748_v17  ;;  %v1190_v17 = vmul.f32 %v3762_v51, %v3585_v56  ;;  %v1191_v26 = vmul.f32 %v3770_v32, %v3581_v54  ;;  %v3808_v41 = vpop.permute.xlu1 %1124  ;;  %v2059_v51 = vld [vmem:[#allocation12 + $0x38] sm:$0xff] }
 0x268   :  { %v2837_v12 = vpop.f32.mrf.mxu0  ;;  %4427 = vst [vmem:[#allocation61_spill] sm:$0xff] %v3808_v41  ;;  %v2865_v27 = vpop.f32.mrf.mxu1 }
 0x269   :  { %2916 = vmatmul.mubr.f32.gmra.mxu0 %v1218_v43 }
 0x26a   :  { %v761_v16 = vpop.f32.mrf.mxu0  ;;  %2918 = vmatprep.mubr.f32.mxu0 %v1219_v1  ;;  %v1223_v1 = vadd.f32 %v2837_v12, %v1191_v26  ;;  %v906_v32 = vpop.f32.mrf.mxu1  ;;  %v1195_v12 = vmul.f32 %v3794_v19, %v3682_v60  ;;  %v2062_v19 = vld [vmem:[#allocation12 + $0x50] sm:$0xff] }
 0x26b   :  { %v1221_v22 = vadd.f32 %v1189_v23, %v761_v16  ;;  %v3814_v23 = vpop.permute.xlu0 %1129 }
 0x26c   :  { %v2838_v21 = vpop.f32.mrf.mxu0  ;;  %4428 = vst [vmem:[#allocation62_spill] sm:$0xff] %v3814_v23 }
 0x26d   :  { %2919 = vmatmul.mubr.f32.gmra.mxu0 %v1220_v46  ;;  %v1224_v16 = vadd.f32 %v2838_v21, %v1192_v25  ;;  %v1225_v46 = vadd.f32 %v1193_v63, %v3754_v33  ;;  %v1196_v21 = vmul.f32 %v3800_v49, %v3689_v4 }
 0x26e   :  { %v764_v42 = vpop.f32.mrf.mxu0  ;;  %2921 = vmatprep.mubr.f32.mxu0 %v1221_v22  ;;  %v1194_v22 = vmul.f32 %v3788_v61, %v3699_v7 }
 0x26f   :  { %v1222_v43 = vadd.f32 %v1190_v17, %v764_v42  ;;  %v3821_v17 = vpop.permute.xlu1 %1134  ;;  %v1227_v42 = vadd.f32 %v3748_v24, %v1195_v12  ;;  %v3827_v33 = vpop.permute.xlu0 %1139  ;;  %v1228_v25 = vadd.f32 %v3764_v50, %v1196_v21  ;;  %v1199_v24 = vmul.f32 %v3814_v23, %v3663_v45 }
 0x270   :  { %4429 = vst [vmem:[#allocation63_spill] sm:$0xff] %v3821_v17  ;;  %v1226_v26 = vadd.f32 %v1194_v22, %v3772_v34  ;;  %4430 = vst [vmem:[#allocation64_spill] sm:$0xff] %v3827_v33  ;;  %v1198_v34 = vmul.f32 %v3808_v41, %v3679_v57  ;;  %v1200_v50 = vmul.f32 %v3821_v17, %v3667_v47  ;;  %v2064_v17 = vld [vmem:[#allocation12 + $0x60] sm:$0xff] }
 0x271   :  { %2922 = vmatmul.mubr.f32.gmra.mxu0 %v1222_v43  ;;  %v2866_v43 = vpop.f32.mrf.mxu1 }
 0x272   :  { %2924 = vmatprep.mubr.f32.mxu0 %v1223_v1  ;;  %v1197_v1 = vmul.f32 %v3804_v36, %v3670_v48  ;;  %v1230_v12 = vadd.f32 %v1198_v34, %v893_v20  ;;  %v2063_v36 = vld [vmem:[#allocation12 + $0x58] sm:$0xff] }
 0x273   :  { %v3832_v63 = vpop.permute.xlu1 %1144  ;;  %v3838_v22 = vpop.permute.xlu0 %1149 }
 0x274   :  { %4431 = vst [vmem:[#allocation65_spill] sm:$0xff] %v3832_v63  ;;  %4432 = vst [vmem:[#allocation66_spill] sm:$0xff] %v3838_v22 }
 0x275   :  { %2925 = vmatmul.mubr.f32.gmra.mxu0 %v1224_v16  ;;  %v1229_v16 = vadd.f32 %v1197_v1, %v890_v2  ;;  %v1201_v2 = vmul.f32 %v3827_v33, %v3657_v40  ;;  %v1232_v1 = vadd.f32 %v2862_v18, %v1200_v50 }
 0x276   :  { %2927 = vmatprep.mubr.f32.mxu0 %v1225_v46  ;;  %v909_v46 = vpop.f32.mrf.mxu1 }
 0x277   :  { %v3845_v21 = vpop.permute.xlu1 %1154  ;;  %v3849_v20 = vpop.permute.xlu0 %1159 }
 0x278   :  { %4433 = vst [vmem:[#allocation67_spill] sm:$0xff] %v3845_v21  ;;  %4434 = vst [vmem:[#allocation68_spill] sm:$0xff] %v3849_v20  ;;  %v1204_v18 = vmul.f32 %v3845_v21, %v3655_v39 }
 0x279   :  { %2928 = vmatmul.mubr.f32.gmra.mxu0 %v1226_v26  ;;  %v1231_v26 = vadd.f32 %v3780_v14, %v1199_v24  ;;  %v1203_v14 = vmul.f32 %v3838_v22, %v3651_v37  ;;  %v2065_v22 = vld [vmem:[#allocation12 + $0x68] sm:$0xff] }
 0x27a   :  { %2930 = vmatprep.mubr.f32.mxu0 %v1227_v42  ;;  %v2869_v42 = vpop.f32.mrf.mxu1  ;;  %v1236_v50 = vadd.f32 %v2866_v43, %v1204_v18 }
 0x27b   :  { %v3853_v24 = vpop.permute.xlu1 %1164 }
 0x27c   :  { %v922_v23 = vpop.f32.mrf.mxu1  ;;  %4435 = vst [vmem:[#allocation69_spill] sm:$0xff] %v3853_v24 }
 0x27d   :  { %2931 = vmatmul.mubr.f32.gmra.mxu0 %v1228_v25  ;;  %v1233_v25 = vadd.f32 %v1201_v2, %v906_v32  ;;  %v1205_v32 = vmul.f32 %v3849_v20, %v3641_v29  ;;  %v2066_v20 = vld [vmem:[#allocation12 + $0x70] sm:$0xff] }
 0x27e   :  { %2933 = vmatprep.mubr.f32.mxu0 %v1229_v16  ;;  %v1202_v16 = vmul.f32 %v3832_v63, %v3661_v44  ;;  %v2870_v33 = vpop.f32.mrf.mxu1 }
 0x27f   :  { %v1237_v2 = vadd.f32 %v1205_v32, %v922_v23 }
 0x280   :  { %v1234_v34 = vadd.f32 %v1202_v16, %v909_v46  ;;  %v1206_v46 = vmul.f32 %v3853_v24, %v3647_v35  ;;  %v2067_v24 = vld [vmem:[#allocation12 + $0x78] sm:$0xff] }
 0x281   :  { %2934 = vmatmul.mubr.f32.gmra.mxu0 %v1230_v12  ;;  %v1235_v12 = vadd.f32 %v2865_v27, %v1203_v14  ;;  %3015 = vmatprep.subr.mxu0 %v2067_v24 }
 0x282   :  { %2936 = vmatprep.mubr.f32.mxu0 %v1231_v26  ;;  %v3859_v26 = vpop.permute.xlu0 %1169  ;;  %3016 = vmatpush3.msra.mxu0 %v2067_v24  ;;  %v2061_v24 = vld [vmem:[#allocation12 + $0x48] sm:$0xff] }
 0x283   :  { %4436 = vst [vmem:[#allocation70_spill] sm:$0xff] %v3859_v26  ;;  %v1207_v27 = vmul.f32 %v3859_v26, %v3645_v31  ;;  %3017 = vmatprep.subr.mxu0 %v2066_v20 }
 0x284   :  { %3018 = vmatpush3.msra.mxu0 %v2066_v20  ;;  %v2060_v20 = vld [vmem:[#allocation12 + $0x40] sm:$0xff] }
 0x285   :  { %2937 = vmatmul.mubr.f32.gmra.mxu0 %v1232_v1  ;;  %v925_v1 = vpop.f32.mrf.mxu1  ;;  %v1239_v14 = vadd.f32 %v2869_v42, %v1207_v27  ;;  %3019 = vmatprep.subr.mxu0 %v2065_v22 }
 0x286   :  { %2939 = vmatprep.mubr.f32.mxu0 %v1233_v25  ;;  %v3863_v25 = vpop.permute.xlu1 %1174  ;;  %v1238_v16 = vadd.f32 %v1206_v46, %v925_v1  ;;  %3020 = vmatpush3.msra.mxu0 %v2065_v22 }
 0x287   :  { %4437 = vst [vmem:[#allocation71_spill] sm:$0xff] %v3863_v25  ;;  %3021 = vmatprep.subr.mxu0 %v2064_v17 }
 0x288   :  { %3022 = vmatpush3.msra.mxu0 %v2064_v17  ;;  %v2057_v17 = vld [vmem:[#allocation12 + $0x28] sm:$0xff] }
 0x289   :  { %2940 = vmatmul.mubr.f32.gmra.mxu0 %v1234_v34  ;;  %v1208_v34 = vmul.f32 %v3863_v25, %v3643_v30  ;;  %3023 = vmatprep.subr.mxu0 %v2063_v36 }
 0x28a   :  { %2942 = vmatprep.mubr.f32.mxu0 %v1235_v12  ;;  %3024 = vmatpush3.msra.mxu0 %v2063_v36  ;;  %v2056_v36 = vld [vmem:[#allocation12 + $0x20] sm:$0xff] }
 0x28b   :  { %v1240_v43 = vadd.f32 %v2870_v33, %v1208_v34  ;;  %3025 = vmatprep.subr.mxu0 %v2062_v19 }
 0x28c   :  { %3026 = vmatpush3.msra.mxu0 %v2062_v19  ;;  %v2055_v19 = vld [vmem:[#allocation12 + $0x18] sm:$0xff] }
 0x28d   :  { %2943 = vmatmul.mubr.f32.gmra.mxu0 %v1236_v50  ;;  %3027 = vmatprep.subr.mxu0 %v2061_v24 }
 0x28e   :  { %2945 = vmatprep.mubr.f32.mxu0 %v1237_v2  ;;  %3028 = vmatpush3.msra.mxu0 %v2061_v24  ;;  %v2054_v24 = vld [vmem:[#allocation12 + $0x10] sm:$0xff] }
 0x28f   :  { %3029 = vmatprep.subr.mxu0 %v2060_v20 }
 0x290   :  { %3030 = vmatpush3.msra.mxu0 %v2060_v20  ;;  %v3916_v20 = vld [vmem:[%s4332_s9 + $0x2] ss:$0 sm:$0xff] }
 0x291   :  { %2946 = vmatmul.mubr.f32.gmra.mxu0 %v1238_v16  ;;  %3031 = vmatprep.subr.mxu0 %v2059_v51 }
 0x292   :  { %2948 = vmatprep.mubr.f32.mxu0 %v1239_v14  ;;  %3032 = vmatpush3.msra.mxu0 %v2059_v51 }
 0x293   :  { %3033 = vmatprep.subr.mxu0 %v2058_v15 }
 0x294   :  { %3034 = vmatpush3.msra.mxu0 %v2058_v15 }
 0x295   :  { %2949 = vmatmul.mubr.f32.gmra.mxu0 %v1240_v43  ;;  %3035 = vmatprep.subr.mxu0 %v2057_v17 }
 0x296   :  { %3036 = vmatpush3.msra.mxu0 %v2057_v17  ;;  %v3923_v17 = vld [vmem:[%s4332_s9 + $0x3] ss:$0 sm:$0xff] }
 0x297   :  { %3037 = vmatprep.subr.mxu0 %v2056_v36 }
 0x298   :  { %3038 = vmatpush3.msra.mxu0 %v2056_v36 }
 0x299   :  { %3039 = vmatprep.subr.mxu0 %v2055_v19 }
 0x29a   :  { %3040 = vmatpush3.msra.mxu0 %v2055_v19 }
 0x29b   :  { %3041 = vmatprep.subr.mxu0 %v2054_v24 }
 0x29c   :  { %3042 = vmatpush3.msra.mxu0 %v2054_v24 }
 0x319   :  { %v3869_v23 = vpop.f32.mrf.mxu0 }
 0x31a   :  { %4438 = vst [vmem:[#allocation72_spill] sm:$0xff] %v3869_v23 }
 0x31b   :  { %v3871_v12 = vpop.f32.mrf.mxu0 }
 0x31c   :  { %4439 = vst [vmem:[#allocation73_spill] sm:$0xff] %v3871_v12 }
 0x31d   :  { %v3873_v18 = vpop.f32.mrf.mxu0 }
 0x31e   :  { %4440 = vst [vmem:[#allocation74_spill] sm:$0xff] %v3873_v18 }
 0x31f   :  { %v3875_v32 = vpop.f32.mrf.mxu0 }
 0x320   :  { %4441 = vst [vmem:[#allocation75_spill] sm:$0xff] %v3875_v32 }
 0x321   :  { %v3877_v50 = vpop.f32.mrf.mxu0 }
 0x322   :  { %4442 = vst [vmem:[#allocation76_spill] sm:$0xff] %v3877_v50 }
 0x323   :  { %v3879_v2 = vpop.f32.mrf.mxu0 }
 0x325   :  { %v3881_v42 = vpop.f32.mrf.mxu0 }
 0x327   :  { %v3883_v1 = vpop.f32.mrf.mxu0 }
 0x329   :  { %v3885_v46 = vpop.f32.mrf.mxu0 }
 0x32b   :  { %v3887_v33 = vpop.f32.mrf.mxu0 }
 0x32d   :  { %v3889_v27 = vpop.f32.mrf.mxu0 }
 0x32f   :  { %v3891_v16 = vpop.f32.mrf.mxu0 }
 0x331   :  { %v3893_v14 = vpop.f32.mrf.mxu0 }
 0x333   :  { %v3895_v34 = vpop.f32.mrf.mxu0 }
 0x335   :  { %v3897_v43 = vpop.f32.mrf.mxu0 }
 0x337   :  { %v3899_v25 = vpop.f32.mrf.mxu0 }
 0x339   :  { %v3901_v26 = vpop.f32.mrf.mxu0 }
 0x33b   :  { %v3903_v21 = vpop.f32.mrf.mxu0 }
 0x33d   :  { %v3905_v63 = vpop.f32.mrf.mxu0 }
 0x33f   :  { %v3907_v41 = vpop.f32.mrf.mxu0 }
 0x341   :  { %v3909_v49 = vpop.f32.mrf.mxu0 }
 0x343   :  { %v3911_v61 = vpop.f32.mrf.mxu0 }
 0x345   :  { %v2938_v28 = vpop.f32.mrf.mxu0 }
 0x347   :  { %v1433_v38 = vpop.f32.mrf.mxu0 }
 0x349   :  { %v2941_v22 = vpop.f32.mrf.mxu0 }
 0x34b   :  { %v1443_v13 = vpop.f32.mrf.mxu0 }
 0x34c   :  { %v1510_v0 = vmul.f32 %v3916_v20, %v1443_v13 }
 0x34d   :  { %v2944_v10 = vpop.f32.mrf.mxu0 }
 0x34f   :  { %v1453_v8 = vpop.f32.mrf.mxu0 }
 0x350   :  { %v1512_v36 = vmul.f32 %v3916_v20, %v1453_v8 }
 0x351   :  { %v2947_v23 = vpop.f32.mrf.mxu0 }
 0x352   :  { %v1515_v51 = vmul.f32 %v2947_v23, %v3916_v20  ;;  %v1513_v23 = vmul.f32 %v2944_v10, %v3916_v20  ;;  %v1548_v32 = vadd.f32 %v3923_v17, %v1512_v36 }
 0x353   :  { %v1463_v11 = vpop.f32.mrf.mxu0 }
 0x354   :  { %v1514_v15 = vmul.f32 %v3916_v20, %v1463_v11  ;;  %v1551_v11 = vadd.f32 %v3923_v17, %v1515_v51  ;;  %v1549_v24 = vadd.f32 %v3923_v17, %v1513_v23  ;;  %v1508_v51 = vmul.f32 %v3916_v20, %v1433_v38 }
 0x355   :  { %v2950_v55 = vpop.f32.mrf.mxu0  ;;  %v1580_v9 = vmax.f32 %v1548_v32, 0.0 }
 0x356   :  { %v1550_v5 = vadd.f32 %v3923_v17, %v1514_v15  ;;  %v1517_v12 = vmul.f32 %v2950_v55, %v3916_v20  ;;  %v1511_v55 = vmul.f32 %v2941_v22, %v3916_v20  ;;  %v1583_v50 = vmax.f32 %v1551_v11, 0.0 }
 0x357   :  { %v1473_v3 = vpop.f32.mrf.mxu0  ;;  %v1581_v36 = vmax.f32 %v1549_v24, 0.0 }
 0x358   :  { %v1553_v19 = vadd.f32 %v3923_v17, %v1517_v12  ;;  %v1516_v18 = vmul.f32 %v3916_v20, %v1473_v3  ;;  %v1582_v62 = vmax.f32 %v1550_v5, 0.0  ;;  %v1546_v12 = vadd.f32 %v3923_v17, %v1510_v0 }
 0x359   :  { %v1547_v22 = vadd.f32 %v3923_v17, %v1511_v55  ;;  %v3951_v23 = vadd.f32 %v1583_v50, %v3647_v35  ;;  %v1507_v35 = vmul.f32 %v3909_v49, %v3916_v20  ;;  %v3967_v50 = vadd.f32 %v1581_v36, %v3655_v39 }
 0x35a   :  { %v1585_v8 = vmax.f32 %v1553_v19, 0.0  ;;  %v1552_v15 = vadd.f32 %v3923_v17, %v1516_v18  ;;  %v3940_v3 = vadd.f32 %v1582_v62, %v3641_v29  ;;  %v1509_v18 = vmul.f32 %v2938_v28, %v3916_v20 }
 0x35b   :  { %v1506_v62 = vmul.f32 %v3916_v20, %v3911_v61  ;;  %v1544_v29 = vadd.f32 %v3923_v17, %v1508_v51  ;;  %v1579_v32 = vmax.f32 %v1547_v22, 0.0  ;;  %v1504_v61 = vmul.f32 %v3916_v20, %v3907_v41 }
 0x35c   :  { %v1584_v10 = vmax.f32 %v1552_v15, 0.0  ;;  %v3943_v13 = vadd.f32 %v1585_v8, %v3643_v30  ;;  %v1578_v30 = vmax.f32 %v1546_v12, 0.0  ;;  %v1696_v38 = vpack.c.bf16 %v3951_v23, %v3940_v3 }
 0x35d   :  { %v1545_v28 = vadd.f32 %v3923_v17, %v1509_v18  ;;  %v1505_v49 = vmul.f32 %v3905_v63, %v3916_v20  ;;  %v1543_v39 = vadd.f32 %v3923_v17, %v1507_v35  ;;  %v3981_v15 = vadd.f32 %v1579_v32, %v3661_v44 }
 0x35e   :  { %v3946_v5 = vadd.f32 %v1584_v10, %v3645_v31  ;;  %v3959_v31 = vadd.f32 %v1580_v9, %v3651_v37  ;;  %v1542_v37 = vadd.f32 %v3923_v17, %v1506_v62  ;;  %v1576_v9 = vmax.f32 %v1544_v29, 0.0 }
 0x35f   :  { %v3973_v11 = vadd.f32 %v1578_v30, %v3657_v40  ;;  %v1577_v8 = vmax.f32 %v1545_v28, 0.0  ;;  %v1502_v41 = vmul.f32 %v3916_v20, %v3903_v21  ;;  %v1540_v40 = vadd.f32 %v3923_v17, %v1504_v61 }
 0x360   :  { %v1697_v0 = vpack.c.bf16 %v3943_v13, %v3946_v5  ;;  %v1695_v19 = vpack.c.bf16 %v3967_v50, %v3959_v31  ;;  %v1574_v55 = vmax.f32 %v1542_v37, 0.0  ;;  %v3987_v24 = vadd.f32 %v1576_v9, %v3663_v45 }
 0x361   :  { %v1694_v10 = vpack.c.bf16 %v3981_v15, %v3973_v11  ;;  %v1503_v63 = vmul.f32 %v3901_v26, %v3916_v20  ;;  %v1541_v44 = vadd.f32 %v3923_v17, %v1505_v49  ;;  %v1575_v51 = vmax.f32 %v1543_v39, 0.0 }
 0x362   :  { %2951 = vmatprep.subr.bf16.mxu1 %v1697_v0  ;;  %v3995_v12 = vadd.f32 %v1577_v8, %v3667_v47  ;;  %v1500_v21 = vmul.f32 %v3916_v20, %v3899_v25  ;;  %v1538_v45 = vadd.f32 %v3923_v17, %v1502_v41  ;;  %v1572_v18 = vmax.f32 %v1540_v40, 0.0 }
 0x363   :  { %2952 = vmatpush3.bf16.msra.mxu1 %v1697_v0  ;;  %v4001_v22 = vadd.f32 %v1574_v55, %v3670_v48  ;;  %v1501_v26 = vmul.f32 %v3897_v43, %v3916_v20  ;;  %v1539_v47 = vadd.f32 %v3923_v17, %v1503_v63  ;;  %v1573_v0 = vmax.f32 %v1541_v44, 0.0 }
 0x364   :  { %2953 = vmatprep.subr.bf16.mxu1 %v1696_v38  ;;  %v1693_v36 = vpack.c.bf16 %v3995_v12, %v3987_v24  ;;  %v4009_v62 = vadd.f32 %v1575_v51, %v3679_v57  ;;  %v1498_v25 = vmul.f32 %v3916_v20, %v3895_v34  ;;  %v1536_v48 = vadd.f32 %v3923_v17, %v1500_v21 }
 0x365   :  { %v1570_v29 = vmax.f32 %v1538_v45, 0.0  ;;  %v4015_v30 = vadd.f32 %v1572_v18, %v3682_v60  ;;  %v1499_v43 = vmul.f32 %v3893_v14, %v3916_v20  ;;  %v1537_v57 = vadd.f32 %v3923_v17, %v1501_v26  ;;  %v4443_v18 = vld [vmem:[#allocation34_spill] sm:$0xff] }
 0x366   :  { %v1571_v35 = vmax.f32 %v1539_v47, 0.0  ;;  %v4023_v28 = vadd.f32 %v1573_v0, %v3689_v4  ;;  %v1496_v34 = vmul.f32 %v3916_v20, %v3891_v16  ;;  %v1534_v60 = vadd.f32 %v3923_v17, %v1498_v25  ;;  %v4445_v47 = vld [vmem:[#allocation20_spill] sm:$0xff] }
 0x367   :  { %2954 = vmatpush3.bf16.msra.mxu1 %v1696_v38  ;;  %v1692_v38 = vpack.c.bf16 %v4009_v62, %v4001_v22  ;;  %v1568_v32 = vmax.f32 %v1536_v48, 0.0  ;;  %v4029_v61 = vadd.f32 %v1570_v29, %v3692_v6  ;;  %v1497_v14 = vmul.f32 %v3889_v27, %v3916_v20  ;;  %v4447_v29 = vld [vmem:[#allocation21_spill] sm:$0xff] }
 0x368   :  { %2955 = vmatprep.subr.bf16.mxu1 %v1695_v19  ;;  %v1691_v37 = vpack.c.bf16 %v4023_v28, %v4015_v30  ;;  %v1535_v4 = vadd.f32 %v3923_v17, %v1499_v43  ;;  %v1569_v9 = vmax.f32 %v1537_v57, 0.0  ;;  %v1494_v16 = vmul.f32 %v3916_v20, %v3887_v33  ;;  %v4448_v57 = vld [vmem:[#allocation74_spill] sm:$0xff] }
 0x369   :  { %v1532_v6 = vadd.f32 %v3923_v17, %v1496_v34  ;;  %v1566_v49 = vmax.f32 %v1534_v60, 0.0  ;;  %v4043_v39 = vadd.f32 %v1568_v32, %v3581_v54  ;;  %v1495_v27 = vmul.f32 %v3885_v46, %v3916_v20  ;;  %v4449_v32 = vld [vmem:[#allocation22_spill] sm:$0xff] }
 0x36a   :  { %v1567_v41 = vmax.f32 %v1535_v4, 0.0  ;;  %v4051_v40 = vadd.f32 %v1569_v9, %v3579_v53  ;;  %v1492_v33 = vmul.f32 %v3916_v20, %v3883_v1  ;;  %v1530_v54 = vadd.f32 %v3923_v17, %v1494_v16 }
 0x36b   :  { %2956 = vmatpush3.bf16.msra.mxu1 %v1695_v19  ;;  %v4037_v19 = vadd.f32 %v1571_v35, %v3699_v7  ;;  %v1533_v7 = vadd.f32 %v3923_v17, %v1497_v14  ;;  %v1564_v55 = vmax.f32 %v1532_v6, 0.0  ;;  %v1493_v46 = vmul.f32 %v3881_v42, %v3916_v20  ;;  %v4450_v14 = vld [vmem:[#allocation73_spill] sm:$0xff]  ;;  %v4451_v6 = vld [vmem:[#allocation23_spill] sm:$0xff] }
 0x36c   :  { %2957 = vmatprep.subr.bf16.mxu1 %v1694_v10  ;;  %v1673_v63 = vpack.c.bf16 %v4051_v40, %v4043_v39  ;;  %v1531_v53 = vadd.f32 %v3923_v17, %v1495_v27  ;;  %v4065_v51 = vadd.f32 %v1567_v41, %v3585_v56  ;;  %v1490_v1 = vmul.f32 %v3916_v20, %v3879_v2  ;;  %v4444_v56 = vld [vmem:[#allocation76_spill] sm:$0xff] }
 0x36d   :  { %v1690_v8 = vpack.c.bf16 %v4037_v19, %v4029_v61  ;;  %v1565_v44 = vmax.f32 %v1533_v7, 0.0  ;;  %v1562_v21 = vmax.f32 %v1530_v54, 0.0  ;;  %v4071_v45 = vadd.f32 %v1564_v55, %v3591_v59  ;;  %v4446_v59 = vld [vmem:[#allocation75_spill] sm:$0xff]  ;;  %v4453_v7 = vld [vmem:[#allocation36_spill] sm:$0xff] }
 0x36e   :  { %v1529_v26 = vadd.f32 %v3923_v17, %v1493_v46  ;;  %v1563_v2 = vmax.f32 %v1531_v53, 0.0  ;;  %v1488_v25 = vmul.f32 %v3916_v20, %v4446_v59  ;;  %v1489_v35 = vmul.f32 %v4448_v57, %v3916_v20  ;;  %v4454_v41 = vld [vmem:[#allocation72_spill] sm:$0xff] }
 0x36f   :  { %2958 = vmatpush3.bf16.msra.mxu1 %v1694_v10  ;;  %v4057_v10 = vadd.f32 %v1566_v49, %v3577_v52  ;;  %v1528_v52 = vadd.f32 %v3923_v17, %v1492_v33  ;;  %v4081_v0 = vadd.f32 %v1565_v44, %v4445_v47  ;;  %v1486_v4 = vmul.f32 %v3916_v20, %v4450_v14  ;;  %v4459_v47 = vld [vmem:[#allocation37_spill] sm:$0xff]  ;;  %v3125_v14 = vld [vmem:[#allocation6] sm:$0xff]  }
 0x370   :  { %2959 = vmatprep.subr.bf16.mxu1 %v1693_v36  ;;  %v1561_v60 = vmax.f32 %v1529_v26, 0.0  ;;  %v1524_v9 = vadd.f32 %v3923_v17, %v1488_v25  ;;  %v1487_v33 = vmul.f32 %v4454_v41, %v3916_v20  ;;  %v1525_v54 = vadd.f32 %v3923_v17, %v1489_v35  ;;  %v4458_v26 = vld [vmem:[#allocation27_spill] sm:$0xff]  ;;  %v4460_v25 = vld [vmem:[#allocation38_spill] sm:$0xff]  ;;  %v2053_v41 = vld [vmem:[#allocation12 + $0x8] sm:$0xff] }
 0x371   :  { %v1672_v42 = vpack.c.bf16 %v4065_v51, %v4057_v10  ;;  %v1560_v48 = vmax.f32 %v1528_v52, 0.0  ;;  %v1671_v43 = vpack.c.bf16 %v4081_v0, %v4071_v45  ;;  %v1522_v53 = vadd.f32 %v3923_v17, %v1486_v4  ;;  %v4463_v35 = vld [vmem:[#allocation30_spill] sm:$0xff]  ;;  %v3126_v4 = vld [vmem:[#allocation6 + $0x8] sm:$0xff]   ;;  %3043 = vmatprep.subr.mxu0 %v2053_v41 }
 0x372   :  { %v1556_v44 = vmax.f32 %v1524_v9, 0.0  ;;  %v3127_v9 = vld [vmem:[#allocation6 + $0x10] sm:$0xff]   ;;  %3044 = vmatpush3.msra.mxu0 %v2053_v41  ;;  %v4475_v41 = vld [vmem:[#allocation47_spill] sm:$0xff] }
 0x373   :  { %2960 = vmatpush3.bf16.msra.mxu1 %v1693_v36  ;;  %v1491_v36 = vmul.f32 %v4444_v56, %v3916_v20  ;;  %v4101_v49 = vadd.f32 %v1560_v48, %v4451_v6  ;;  %v1557_v20 = vmax.f32 %v1525_v54, 0.0  ;;  %v4461_v48 = vld [vmem:[#allocation28_spill] sm:$0xff] }
 0x374   :  { %2961 = vmatprep.subr.bf16.mxu1 %v1692_v38  ;;  %v3129_v6 = vld [vmem:[#allocation6 + $0x20] sm:$0xff]  }
 0x375   :  { %v1527_v34 = vadd.f32 %v3923_v17, %v1491_v36  ;;  %v1554_v36 = vmax.f32 %v1522_v53, 0.0 }
 0x377   :  { %2962 = vmatpush3.bf16.msra.mxu1 %v1692_v38  ;;  %v4087_v38 = vadd.f32 %v1562_v21, %v4447_v29  ;;  %v1559_v55 = vmax.f32 %v1527_v34, 0.0  ;;  %v4462_v29 = vld [vmem:[#allocation29_spill] sm:$0xff] }
 0x378   :  { %2963 = vmatprep.subr.bf16.mxu1 %v1691_v37 }
 0x37b   :  { %2964 = vmatpush3.bf16.msra.mxu1 %v1691_v37  ;;  %v4095_v37 = vadd.f32 %v1563_v2, %v4449_v32  ;;  %v4124_v2 = vadd.f32 %v1556_v44, %v4458_v26 }
 0x37c   :  { %2965 = vmatprep.subr.bf16.mxu1 %v1690_v8 }
 0x37d   :  { %v1670_v27 = vpack.c.bf16 %v4095_v37, %v4087_v38 }
 0x37f   :  { %2966 = vmatpush3.bf16.msra.mxu1 %v1690_v8  ;;  %v4452_v8 = vld [vmem:[#allocation35_spill] sm:$0xff] }
 0x380   :  { %2983 = vmatprep.subr.bf16.mxu1 %v1673_v63 }
 0x382   :  { %2968 = vmatmul.mubr.bf16.vlgmr.msra.gmra.mxu1 %v3705_v58  ;;  %v1526_v58 = vadd.f32 %v3923_v17, %v1490_v1  ;;  %v4456_v1 = vld [vmem:[#allocation25_spill] sm:$0xff] }
 0x383   :  { %2984 = vmatpush3.bf16.msra.mxu1 %v1673_v63  ;;  %2971 = vmatprep.mubr.bf16.mxu1 %v4443_v18  ;;  %v4455_v63 = vld [vmem:[#allocation24_spill] sm:$0xff]  ;;  %v4457_v18 = vld [vmem:[#allocation26_spill] sm:$0xff] }
 0x384   :  { %2985 = vmatprep.subr.bf16.mxu1 %v1672_v42  ;;  %v1558_v16 = vmax.f32 %v1526_v58, 0.0  ;;  %v4111_v46 = vadd.f32 %v1561_v60, %v4455_v63  ;;  %v4121_v56 = vadd.f32 %v1559_v55, %v4457_v18  ;;  %v4464_v60 = vld [vmem:[#allocation39_spill] sm:$0xff]  ;;  %v4468_v55 = vld [vmem:[#allocation40_spill] sm:$0xff] }
 0x386   :  { %v4115_v52 = vadd.f32 %v1558_v16, %v4456_v1  ;;  %v1669_v21 = vpack.c.bf16 %v4111_v46, %v4101_v49  ;;  %v3128_v16 = vld [vmem:[#allocation6 + $0x18] sm:$0xff]  }
 0x387   :  { %2986 = vmatpush3.bf16.msra.mxu1 %v1672_v42  ;;  %v1523_v42 = vadd.f32 %v3923_v17, %v1487_v33  ;;  %v4131_v17 = vadd.f32 %v1557_v20, %v4461_v48  ;;  %v2052_v33 = vld [vmem:[#allocation12] sm:$0xff]  ;;  %v4470_v20 = vld [vmem:[#allocation41_spill] sm:$0xff] }
 0x388   :  { %2987 = vmatprep.subr.bf16.mxu1 %v1671_v43  ;;  %v1668_v59 = vpack.c.bf16 %v4121_v56, %v4115_v52  ;;  %3045 = vmatprep.subr.mxu0 %v2052_v33  ;;  %v1990_v18 = vmul.f32 %v4124_v2, %v4470_v20  ;;  %v4472_v48 = vld [vmem:[#allocation44_spill] sm:$0xff]  ;;  %v4478_v20 = vld [vmem:[#allocation50_spill] sm:$0xff] }
 0x389   :  { %v1555_v58 = vmax.f32 %v1523_v42, 0.0  ;;  %v1667_v57 = vpack.c.bf16 %v4131_v17, %v4124_v2  ;;  %3046 = vmatpush3.msra.mxu0 %v2052_v33  ;;  %v1995_v33 = vmul.f32 %v4111_v46, %v4475_v41  ;;  %v4483_v41 = vld [vmem:[#allocation55_spill] sm:$0xff] }
 0x38a   :  { %2972 = vmatmul.mubr.bf16.gmra.mxu1 %v4452_v8  ;;  %v4465_v8 = vld [vmem:[#allocation31_spill] sm:$0xff] }
 0x38b   :  { %2988 = vmatpush3.bf16.msra.mxu1 %v1671_v43  ;;  %2975 = vmatprep.mubr.bf16.mxu1 %v4453_v7  ;;  %v4134_v43 = vadd.f32 %v1554_v36, %v4462_v29  ;;  %v4139_v34 = vadd.f32 %v1555_v58, %v4463_v35  ;;  %v4467_v7 = vld [vmem:[#allocation33_spill] sm:$0xff]  ;;  %v1992_v29 = vmul.f32 %v4115_v52, %v4472_v48  ;;  %v4480_v48 = vld [vmem:[#allocation52_spill] sm:$0xff] }
 0x38c   :  { %2989 = vmatprep.subr.bf16.mxu1 %v1670_v27 }
 0x38d   :  { %v1666_v32 = vpack.c.bf16 %v4139_v34, %v4134_v43  ;;  %v1988_v63 = vmul.f32 %v4134_v43, %v4468_v55 }
 0x38f   :  { %2990 = vmatpush3.bf16.msra.mxu1 %v1670_v27  ;;  %v4466_v27 = vld [vmem:[#allocation32_spill] sm:$0xff] }
 0x390   :  { %2991 = vmatprep.subr.bf16.mxu1 %v1669_v21 }
 0x392   :  { %2976 = vmatmul.mubr.bf16.gmra.mxu1 %v4459_v47 }
 0x393   :  { %2992 = vmatpush3.bf16.msra.mxu1 %v1669_v21  ;;  %2979 = vmatprep.mubr.bf16.mxu1 %v4460_v25  ;;  %v4469_v21 = vld [vmem:[#allocation42_spill] sm:$0xff]  ;;  %v4471_v25 = vld [vmem:[#allocation43_spill] sm:$0xff] }
 0x394   :  { %2993 = vmatprep.subr.bf16.mxu1 %v1668_v59  ;;  %v1989_v42 = vmul.f32 %v4139_v34, %v4469_v21  ;;  %v1991_v58 = vmul.f32 %v4131_v17, %v4471_v25  ;;  %v4477_v21 = vld [vmem:[#allocation49_spill] sm:$0xff]  ;;  %v4479_v25 = vld [vmem:[#allocation51_spill] sm:$0xff] }
 0x397   :  { %2994 = vmatpush3.bf16.msra.mxu1 %v1668_v59 }
 0x398   :  { %2995 = vmatprep.subr.bf16.mxu1 %v1667_v57 }
 0x39a   :  { %2980 = vmatmul.mubr.bf16.gmra.mxu1 %v4464_v60 }
 0x39b   :  { %2996 = vmatpush3.bf16.msra.mxu1 %v1667_v57  ;;  %2999 = vmatprep.mubr.bf16.mxu1 %v3125_v14  ;;  %v4473_v14 = vld [vmem:[#allocation45_spill] sm:$0xff] }
 0x39c   :  { %2997 = vmatprep.subr.bf16.mxu1 %v1666_v32 }
 0x39f   :  { %2998 = vmatpush3.bf16.msra.mxu1 %v1666_v32 }
 0x3a2   :  { %3000 = vmatmul.mubr.bf16.vlgmr.msra.gmra.mxu1 %v3126_v4  ;;  %v1993_v4 = vmul.f32 %v4121_v56, %v4473_v14  ;;  %v4481_v14 = vld [vmem:[#allocation53_spill] sm:$0xff] }
 0x3a3   :  { %3003 = vmatprep.mubr.bf16.mxu1 %v3127_v9  ;;  %v4474_v9 = vld [vmem:[#allocation46_spill] sm:$0xff] }
 0x3aa   :  { %3004 = vmatmul.mubr.bf16.gmra.mxu1 %v3128_v16  ;;  %v1994_v16 = vmul.f32 %v4101_v49, %v4474_v9  ;;  %v4482_v9 = vld [vmem:[#allocation54_spill] sm:$0xff] }
 0x3ab   :  { %3007 = vmatprep.mubr.bf16.mxu1 %v3129_v6 }
 0x3b2   :  { %3008 = vmatmul.mubr.bf16.gmra.mxu1 %v4465_v8 }
 0x3b3   :  { %3011 = vmatprep.mubr.bf16.mxu1 %v4466_v27 }
 0x3ba   :  { %3012 = vmatmul.mubr.bf16.gmra.mxu1 %v4467_v7 }
 0x442   :  { %v2969_v54 = vpop.f32.mrf.mxu1 }
 0x443   :  { %v2022_v47 = vadd.f32 %v2969_v54, %v1990_v18  ;;  %v4476_v54 = vld [vmem:[#allocation48_spill] sm:$0xff]  ;;  %v1998_v18 = vmul.f32 %v4071_v45, %v4478_v20  ;;  %v4486_v20 = vld [vmem:[#allocation58_spill] sm:$0xff] }
 0x444   :  { %v1732_v53 = vpop.f32.mrf.mxu1  ;;  %v1996_v55 = vmul.f32 %v4087_v38, %v4476_v54  ;;  %v4484_v54 = vld [vmem:[#allocation56_spill] sm:$0xff] }
 0x445   :  { %v2020_v44 = vadd.f32 %v1988_v63, %v1732_v53 }
 0x446   :  { %v2970_v1 = vpop.f32.mrf.mxu1 }
 0x447   :  { %3047 = vmatprep.mubr.f32.mxu0 %v2020_v44  ;;  %v2023_v35 = vadd.f32 %v2970_v1, %v1991_v58  ;;  %v1999_v58 = vmul.f32 %v4081_v0, %v4479_v25  ;;  %v4487_v25 = vld [vmem:[#allocation59_spill] sm:$0xff] }
 0x448   :  { %v1735_v36 = vpop.f32.mrf.mxu1 }
 0x449   :  { %v2021_v26 = vadd.f32 %v1989_v42, %v1735_v36  ;;  %v1997_v42 = vmul.f32 %v4095_v37, %v4477_v21  ;;  %v4485_v21 = vld [vmem:[#allocation57_spill] sm:$0xff] }
 0x44a   :  { %v2973_v59 = vpop.f32.mrf.mxu1 }
 0x44b   :  { %3048 = vmatmul.mubr.f32.vlgmr.msra.gmra.mxu0 %v2021_v26  ;;  %v2026_v27 = vadd.f32 %v2973_v59, %v1994_v16  ;;  %v2002_v16 = vmul.f32 %v4043_v39, %v4482_v9  ;;  %v4490_v9 = vld [vmem:[#allocation62_spill] sm:$0xff] }
 0x44c   :  { %v1748_v57 = vpop.f32.mrf.mxu1  ;;  %3050 = vmatprep.mubr.f32.mxu0 %v2022_v47 }
 0x44d   :  { %v2024_v60 = vadd.f32 %v1992_v29, %v1748_v57  ;;  %v2000_v29 = vmul.f32 %v4057_v10, %v4480_v48  ;;  %v4488_v48 = vld [vmem:[#allocation60_spill] sm:$0xff] }
 0x44e   :  { %v2974_v32 = vpop.f32.mrf.mxu1 }
 0x44f   :  { %3051 = vmatmul.mubr.f32.gmra.mxu0 %v2023_v35  ;;  %v2027_v53 = vadd.f32 %v2974_v32, %v1995_v33  ;;  %v2003_v33 = vmul.f32 %v4051_v40, %v4483_v41  ;;  %v4491_v41 = vld [vmem:[#allocation63_spill] sm:$0xff] }
 0x450   :  { %v1751_v6 = vpop.f32.mrf.mxu1  ;;  %3053 = vmatprep.mubr.f32.mxu0 %v2024_v60 }
 0x451   :  { %v2025_v8 = vadd.f32 %v1993_v4, %v1751_v6  ;;  %v2001_v4 = vmul.f32 %v4065_v51, %v4481_v14  ;;  %v4489_v14 = vld [vmem:[#allocation61_spill] sm:$0xff] }
 0x452   :  { %v2977_v7 = vpop.f32.mrf.mxu1 }
 0x453   :  { %3054 = vmatmul.mubr.f32.gmra.mxu0 %v2025_v8  ;;  %v2030_v47 = vadd.f32 %v2977_v7, %v1998_v18  ;;  %v2006_v18 = vmul.f32 %v4015_v30, %v4486_v20  ;;  %v4494_v20 = vld [vmem:[#allocation66_spill] sm:$0xff] }
 0x454   :  { %v1764_v63 = vpop.f32.mrf.mxu1  ;;  %3056 = vmatprep.mubr.f32.mxu0 %v2026_v27 }
 0x455   :  { %v2028_v44 = vadd.f32 %v1996_v55, %v1764_v63  ;;  %v2004_v55 = vmul.f32 %v4029_v61, %v4484_v54  ;;  %v4492_v54 = vld [vmem:[#allocation64_spill] sm:$0xff] }
 0x456   :  { %v2978_v1 = vpop.f32.mrf.mxu1 }
 0x457   :  { %3057 = vmatmul.mubr.f32.gmra.mxu0 %v2027_v53  ;;  %v2031_v35 = vadd.f32 %v2978_v1, %v1999_v58  ;;  %v2007_v58 = vmul.f32 %v4023_v28, %v4487_v25  ;;  %v4495_v25 = vld [vmem:[#allocation67_spill] sm:$0xff] }
 0x458   :  { %v1767_v36 = vpop.f32.mrf.mxu1  ;;  %3059 = vmatprep.mubr.f32.mxu0 %v2028_v44 }
 0x459   :  { %v2029_v26 = vadd.f32 %v1997_v42, %v1767_v36  ;;  %v2005_v42 = vmul.f32 %v4037_v19, %v4485_v21  ;;  %v4493_v21 = vld [vmem:[#allocation65_spill] sm:$0xff] }
 0x45a   :  { %v2981_v59 = vpop.f32.mrf.mxu1 }
 0x45b   :  { %3060 = vmatmul.mubr.f32.gmra.mxu0 %v2029_v26  ;;  %v2034_v27 = vadd.f32 %v2981_v59, %v2002_v16  ;;  %v2010_v16 = vmul.f32 %v3987_v24, %v4490_v9  ;;  %v4498_v9 = vld [vmem:[#allocation70_spill] sm:$0xff] }
 0x45c   :  { %v1780_v57 = vpop.f32.mrf.mxu1  ;;  %3062 = vmatprep.mubr.f32.mxu0 %v2030_v47 }
 0x45d   :  { %v2032_v60 = vadd.f32 %v2000_v29, %v1780_v57  ;;  %v2008_v29 = vmul.f32 %v4001_v22, %v4488_v48  ;;  %v4496_v48 = vld [vmem:[#allocation68_spill] sm:$0xff] }
 0x45e   :  { %v2982_v32 = vpop.f32.mrf.mxu1 }
 0x45f   :  { %3063 = vmatmul.mubr.f32.gmra.mxu0 %v2031_v35  ;;  %v2035_v53 = vadd.f32 %v2982_v32, %v2003_v33  ;;  %v2011_v33 = vmul.f32 %v3995_v12, %v4491_v41 }
 0x460   :  { %v1783_v6 = vpop.f32.mrf.mxu1  ;;  %3065 = vmatprep.mubr.f32.mxu0 %v2032_v60 }
 0x461   :  { %v2033_v8 = vadd.f32 %v2001_v4, %v1783_v6  ;;  %v2009_v4 = vmul.f32 %v4009_v62, %v4489_v14  ;;  %v4497_v14 = vld [vmem:[#allocation69_spill] sm:$0xff] }
 0x462   :  { %v3001_v7 = vpop.f32.mrf.mxu1 }
 0x463   :  { %3066 = vmatmul.mubr.f32.gmra.mxu0 %v2033_v8  ;;  %v2038_v47 = vadd.f32 %v3001_v7, %v2006_v18  ;;  %v2014_v18 = vmul.f32 %v3959_v31, %v4494_v20 }
 0x464   :  { %v1845_v63 = vpop.f32.mrf.mxu1  ;;  %3068 = vmatprep.mubr.f32.mxu0 %v2034_v27 }
 0x465   :  { %v2036_v44 = vadd.f32 %v2004_v55, %v1845_v63  ;;  %v2012_v55 = vmul.f32 %v3973_v11, %v4492_v54  ;;  %v4214_v54 = vld [vmem:[%s4332_s9 + $0x4] ss:$0 sm:$0xff] }
 0x466   :  { %v3002_v1 = vpop.f32.mrf.mxu1 }
 0x467   :  { %3069 = vmatmul.mubr.f32.gmra.mxu0 %v2035_v53  ;;  %v2039_v35 = vadd.f32 %v3002_v1, %v2007_v58  ;;  %v2015_v58 = vmul.f32 %v3967_v50, %v4495_v25 }
 0x468   :  { %v1848_v36 = vpop.f32.mrf.mxu1  ;;  %3071 = vmatprep.mubr.f32.mxu0 %v2036_v44 }
 0x469   :  { %v2037_v26 = vadd.f32 %v2005_v42, %v1848_v36  ;;  %v2013_v42 = vmul.f32 %v3981_v15, %v4493_v21 }
 0x46a   :  { %v3005_v59 = vpop.f32.mrf.mxu1 }
 0x46b   :  { %3072 = vmatmul.mubr.f32.gmra.mxu0 %v2037_v26  ;;  %v2042_v27 = vadd.f32 %v3005_v59, %v2010_v16  ;;  %v2018_v16 = vmul.f32 %v3946_v5, %v4498_v9 }
 0x46c   :  { %v1861_v57 = vpop.f32.mrf.mxu1  ;;  %3074 = vmatprep.mubr.f32.mxu0 %v2038_v47 }
 0x46d   :  { %v2040_v60 = vadd.f32 %v2008_v29, %v1861_v57  ;;  %v2016_v29 = vmul.f32 %v3940_v3, %v4496_v48 }
 0x46e   :  { %v3006_v32 = vpop.f32.mrf.mxu1 }
 0x46f   :  { %3075 = vmatmul.mubr.f32.gmra.mxu0 %v2039_v35  ;;  %v2043_v53 = vadd.f32 %v3006_v32, %v2011_v33 }
 0x470   :  { %v1864_v6 = vpop.f32.mrf.mxu1  ;;  %3077 = vmatprep.mubr.f32.mxu0 %v2040_v60 }
 0x471   :  { %v2041_v8 = vadd.f32 %v2009_v4, %v1864_v6  ;;  %v2017_v4 = vmul.f32 %v3951_v23, %v4497_v14 }
 0x472   :  { %v3009_v7 = vpop.f32.mrf.mxu1 }
 0x473   :  { %3078 = vmatmul.mubr.f32.gmra.mxu0 %v2041_v8  ;;  %v2046_v47 = vadd.f32 %v3009_v7, %v2014_v18  ;;  %v4499_v7 = vld [vmem:[#allocation71_spill] sm:$0xff] }
 0x474   :  { %v1877_v63 = vpop.f32.mrf.mxu1  ;;  %3080 = vmatprep.mubr.f32.mxu0 %v2042_v27  ;;  %v2019_v41 = vmul.f32 %v3943_v13, %v4499_v7 }
 0x475   :  { %v2044_v44 = vadd.f32 %v2012_v55, %v1877_v63  ;;  %v4219_v55 = vld [vmem:[%s4332_s9 + $0x5] ss:$0 sm:$0xff]  ;;  %s3291_s9 = smov [#allocation14]  }
 0x476   :  { %v3010_v1 = vpop.f32.mrf.mxu1  ;;  %s2434_s18 = sshll.u32 %s3291_s9, 4  ;;  %s2435_s18 = int_to_ptr.vmem [resolvable:$true] %s2434_s18 }
 0x477   :  { %3081 = vmatmul.mubr.f32.gmra.mxu0 %v2043_v53  ;;  %v2047_v35 = vadd.f32 %v3010_v1, %v2015_v58  ;;  %s3250_s2 = scalar_lea.vmem %s2435_s18, 4096  ;;  %p3255_p3 = scmp.lt.s32.totalorder %s2435_s18, %s2435_s18 }
 0x478   :  { %v1880_v36 = vpop.f32.mrf.mxu1  ;;  %3083 = vmatprep.mubr.f32.mxu0 %v2044_v44  ;;  %p3251_p2 = scmp.ne.s32.totalorder %s2435_s18, %s3250_s2  ;;  %p3256_p4 = scmp.lt.s32.totalorder %s3250_s2, %s3250_s2 }
 0x479   :  { %v2045_v26 = vadd.f32 %v2013_v42, %v1880_v36 }
 0x47a   :  { %v3013_v59 = vpop.f32.mrf.mxu1  ;;  %p3257_p5 = por %p3256_p4, %p3255_p3 }
 0x47b   :  { %3084 = vmatmul.mubr.f32.gmra.mxu0 %v2045_v26  ;;  %v2050_v27 = vadd.f32 %v3013_v59, %v2018_v16 }
 0x47c   :  { %v1893_v57 = vpop.f32.mrf.mxu1  ;;  %3086 = vmatprep.mubr.f32.mxu0 %v2046_v47  ;;  %p3258_p6 = pnand %p3257_p5, %p3251_p2 }
 0x47d   :  { %v2048_v60 = vadd.f32 %v2016_v29, %v1893_v57 }
 0x47e   :  { %v3014_v32 = vpop.f32.mrf.mxu1 }
 0x47f   :  { %3087 = vmatmul.mubr.f32.gmra.mxu0 %v2047_v35  ;;  %v2051_v33 = vadd.f32 %v3014_v32, %v2019_v41 }
 0x480   :  { %v1896_v6 = vpop.f32.mrf.mxu1  ;;  %3089 = vmatprep.mubr.f32.mxu0 %v2048_v60 }
 0x481   :  { %v2049_v8 = vadd.f32 %v2017_v4, %v1896_v6 }
 0x483   :  { %3090 = vmatmul.mubr.f32.gmra.mxu0 %v2049_v8 }
 0x484   :  { %3092 = vmatprep.mubr.f32.mxu0 %v2050_v27 }
 0x487   :  { %3093 = vmatmul.mubr.f32.gmra.mxu0 %v2051_v33 }
 0x50b   :  { %v3049_v63 = vpop.f32.mrf.mxu0 }
 0x50c   :  { %v2298_v53 = vmul.f32 %v3049_v63, %v4214_v54 }
 0x50d   :  { %v2134_v44 = vpop.f32.mrf.mxu0 }
 0x50e   :  { %v2334_v1 = vadd.f32 %v4219_v55, %v2298_v53  ;;  %v2297_v21 = vmul.f32 %v4214_v54, %v2134_v44 }
 0x50f   :  { %v3052_v42 = vpop.f32.mrf.mxu0 }
 0x510   :  { %v2366_v20 = vadd.f32 %v2334_v1, %v4139_v34  ;;  %v2333_v18 = vadd.f32 %v4219_v55, %v2297_v21  ;;  %v2300_v36 = vmul.f32 %v3052_v42, %v4214_v54 }
 0x511   :  { %v2144_v26 = vpop.f32.mrf.mxu0 }
 0x512   :  { %2398 = vst [vmem:[#allocation14 + $0x8] sm:$0xff] %v2366_v20  ;;  %v2365_v47 = vadd.f32 %v2333_v18, %v4134_v43  ;;  %v2336_v59 = vadd.f32 %v4219_v55, %v2300_v36  ;;  %v2299_v25 = vmul.f32 %v4214_v54, %v2144_v26 }
 0x513   :  { %v3055_v58 = vpop.f32.mrf.mxu0 }
 0x514   :  { %2397 = vst [vmem:[#allocation14] sm:$0xff] %v2365_v47  ;;  %v2368_v48 = vadd.f32 %v2336_v59, %v4131_v17  ;;  %v2335_v29 = vadd.f32 %v4219_v55, %v2299_v25  ;;  %v2302_v34 = vmul.f32 %v3055_v58, %v4214_v54 }
 0x515   :  { %v2154_v57 = vpop.f32.mrf.mxu0 }
 0x516   :  { %2400 = vst [vmem:[#allocation14 + $0x18] sm:$0xff] %v2368_v48  ;;  %v2367_v35 = vadd.f32 %v2335_v29, %v4124_v2  ;;  %v2338_v60 = vadd.f32 %v4219_v55, %v2302_v34  ;;  %v2301_v43 = vmul.f32 %v4214_v54, %v2154_v57 }
 0x517   :  { %v3058_v32 = vpop.f32.mrf.mxu0 }
 0x518   :  { %2399 = vst [vmem:[#allocation14 + $0x10] sm:$0xff] %v2367_v35  ;;  %v2370_v14 = vadd.f32 %v2338_v60, %v4121_v56  ;;  %v2337_v4 = vadd.f32 %v4219_v55, %v2301_v43  ;;  %v2304_v17 = vmul.f32 %v3058_v32, %v4214_v54 }
 0x519   :  { %v2164_v9 = vpop.f32.mrf.mxu0 }
 0x51a   :  { %2402 = vst [vmem:[#allocation14 + $0x28] sm:$0xff] %v2370_v14  ;;  %v2369_v16 = vadd.f32 %v2337_v4, %v4115_v52  ;;  %v2340_v6 = vadd.f32 %v4219_v55, %v2304_v17  ;;  %v2303_v2 = vmul.f32 %v4214_v54, %v2164_v9 }
 0x51b   :  { %v3061_v8 = vpop.f32.mrf.mxu0 }
 0x51c   :  { %2401 = vst [vmem:[#allocation14 + $0x20] sm:$0xff] %v2369_v16  ;;  %v2372_v27 = vadd.f32 %v2340_v6, %v4111_v46  ;;  %v2339_v7 = vadd.f32 %v4219_v55, %v2303_v2  ;;  %v2306_v56 = vmul.f32 %v3061_v8, %v4214_v54 }
 0x51d   :  { %v2174_v41 = vpop.f32.mrf.mxu0 }
 0x51e   :  { %2404 = vst [vmem:[#allocation14 + $0x38] sm:$0xff] %v2372_v27  ;;  %v2371_v33 = vadd.f32 %v2339_v7, %v4101_v49  ;;  %v2342_v63 = vadd.f32 %v4219_v55, %v2306_v56  ;;  %v2305_v52 = vmul.f32 %v4214_v54, %v2174_v41 }
 0x51f   :  { %v3064_v53 = vpop.f32.mrf.mxu0 }
 0x520   :  { %2403 = vst [vmem:[#allocation14 + $0x30] sm:$0xff] %v2371_v33  ;;  %v2374_v44 = vadd.f32 %v2342_v63, %v4095_v37  ;;  %v2341_v1 = vadd.f32 %v4219_v55, %v2305_v52  ;;  %v2308_v46 = vmul.f32 %v3064_v53, %v4214_v54 }
 0x521   :  { %v2184_v21 = vpop.f32.mrf.mxu0 }
 0x522   :  { %2406 = vst [vmem:[#allocation14 + $0x48] sm:$0xff] %v2374_v44  ;;  %v2373_v42 = vadd.f32 %v2341_v1, %v4087_v38  ;;  %v2344_v20 = vadd.f32 %v4219_v55, %v2308_v46  ;;  %v2307_v49 = vmul.f32 %v4214_v54, %v2184_v21 }
 0x523   :  { %v3067_v18 = vpop.f32.mrf.mxu0 }
 0x524   :  { %2405 = vst [vmem:[#allocation14 + $0x40] sm:$0xff] %v2373_v42  ;;  %v2376_v36 = vadd.f32 %v2344_v20, %v4081_v0  ;;  %v2343_v26 = vadd.f32 %v4219_v55, %v2307_v49  ;;  %v2310_v37 = vmul.f32 %v3067_v18, %v4214_v54 }
 0x525   :  { %v2194_v47 = vpop.f32.mrf.mxu0 }
 0x526   :  { %2408 = vst [vmem:[#allocation14 + $0x58] sm:$0xff] %v2376_v36  ;;  %v2375_v59 = vadd.f32 %v2343_v26, %v4071_v45  ;;  %v2346_v25 = vadd.f32 %v4219_v55, %v2310_v37  ;;  %v2309_v38 = vmul.f32 %v4214_v54, %v2194_v47 }
 0x527   :  { %v3070_v58 = vpop.f32.mrf.mxu0 }
 0x528   :  { %2407 = vst [vmem:[#allocation14 + $0x50] sm:$0xff] %v2375_v59  ;;  %v2378_v48 = vadd.f32 %v2346_v25, %v4065_v51  ;;  %v2345_v29 = vadd.f32 %v4219_v55, %v2309_v38  ;;  %v2312_v0 = vmul.f32 %v3070_v58, %v4214_v54 }
 0x529   :  { %v2204_v34 = vpop.f32.mrf.mxu0 }
 0x52a   :  { %2410 = vst [vmem:[#allocation14 + $0x68] sm:$0xff] %v2378_v48  ;;  %v2377_v57 = vadd.f32 %v2345_v29, %v4057_v10  ;;  %v2348_v35 = vadd.f32 %v4219_v55, %v2312_v0  ;;  %v2311_v45 = vmul.f32 %v4214_v54, %v2204_v34 }
 0x52b   :  { %v3073_v60 = vpop.f32.mrf.mxu0 }
 0x52c   :  { %2409 = vst [vmem:[#allocation14 + $0x60] sm:$0xff] %v2377_v57  ;;  %v2380_v43 = vadd.f32 %v2348_v35, %v4051_v40  ;;  %v2347_v32 = vadd.f32 %v4219_v55, %v2311_v45  ;;  %v2314_v51 = vmul.f32 %v3073_v60, %v4214_v54 }
 0x52d   :  { %v2214_v14 = vpop.f32.mrf.mxu0 }
 0x52e   :  { %2412 = vst [vmem:[#allocation14 + $0x78] sm:$0xff] %v2380_v43  ;;  %v2379_v4 = vadd.f32 %v2347_v32, %v4043_v39  ;;  %v2350_v17 = vadd.f32 %v4219_v55, %v2314_v51  ;;  %v2313_v10 = vmul.f32 %v4214_v54, %v2214_v14 }
 0x52f   :  { %v3076_v9 = vpop.f32.mrf.mxu0 }
 0x530   :  { %2411 = vst [vmem:[#allocation14 + $0x70] sm:$0xff] %v2379_v4  ;;  %v2382_v16 = vadd.f32 %v2350_v17, %v4037_v19  ;;  %v2349_v6 = vadd.f32 %v4219_v55, %v2313_v10  ;;  %v2316_v40 = vmul.f32 %v3076_v9, %v4214_v54 }
 0x531   :  { %v2224_v2 = vpop.f32.mrf.mxu0 }
 0x532   :  { %2414 = vst [vmem:[#allocation14 + $0x88] sm:$0xff] %v2382_v16  ;;  %v2381_v8 = vadd.f32 %v2349_v6, %v4029_v61  ;;  %v2352_v27 = vadd.f32 %v4219_v55, %v2316_v40  ;;  %v2315_v39 = vmul.f32 %v4214_v54, %v2224_v2 }
 0x533   :  { %v3079_v7 = vpop.f32.mrf.mxu0 }
 0x534   :  { %2413 = vst [vmem:[#allocation14 + $0x80] sm:$0xff] %v2381_v8  ;;  %v2384_v56 = vadd.f32 %v2352_v27, %v4023_v28  ;;  %v2351_v41 = vadd.f32 %v4219_v55, %v2315_v39  ;;  %v2318_v19 = vmul.f32 %v3079_v7, %v4214_v54 }
 0x535   :  { %v2234_v33 = vpop.f32.mrf.mxu0 }
 0x536   :  { %2416 = vst [vmem:[#allocation14 + $0x98] sm:$0xff] %v2384_v56  ;;  %v2383_v63 = vadd.f32 %v2351_v41, %v4015_v30  ;;  %v2354_v52 = vadd.f32 %v4219_v55, %v2318_v19  ;;  %v2317_v61 = vmul.f32 %v4214_v54, %v2234_v33 }
 0x537   :  { %v3082_v53 = vpop.f32.mrf.mxu0 }
 0x538   :  { %2415 = vst [vmem:[#allocation14 + $0x90] sm:$0xff] %v2383_v63  ;;  %v2386_v44 = vadd.f32 %v2354_v52, %v4009_v62  ;;  %v2353_v1 = vadd.f32 %v4219_v55, %v2317_v61  ;;  %v2320_v28 = vmul.f32 %v3082_v53, %v4214_v54 }
 0x539   :  { %v2244_v46 = vpop.f32.mrf.mxu0 }
 0x53a   :  { %2418 = vst [vmem:[#allocation14 + $0xa8] sm:$0xff] %v2386_v44  ;;  %v2385_v21 = vadd.f32 %v2353_v1, %v4001_v22  ;;  %v2356_v42 = vadd.f32 %v4219_v55, %v2320_v28  ;;  %v2319_v30 = vmul.f32 %v4214_v54, %v2244_v46 }
 0x53b   :  { %v3085_v20 = vpop.f32.mrf.mxu0 }
 0x53c   :  { %2417 = vst [vmem:[#allocation14 + $0xa0] sm:$0xff] %v2385_v21  ;;  %v2388_v49 = vadd.f32 %v2356_v42, %v3995_v12  ;;  %v2355_v18 = vadd.f32 %v4219_v55, %v2319_v30  ;;  %v2322_v62 = vmul.f32 %v3085_v20, %v4214_v54 }
 0x53d   :  { %v2254_v36 = vpop.f32.mrf.mxu0 }
 0x53e   :  { %2420 = vst [vmem:[#allocation14 + $0xb8] sm:$0xff] %v2388_v49  ;;  %v2387_v26 = vadd.f32 %v2355_v18, %v3987_v24  ;;  %v2358_v37 = vadd.f32 %v4219_v55, %v2322_v62  ;;  %v2321_v22 = vmul.f32 %v4214_v54, %v2254_v36 }
 0x53f   :  { %v3088_v47 = vpop.f32.mrf.mxu0 }
 0x540   :  { %2419 = vst [vmem:[#allocation14 + $0xb0] sm:$0xff] %v2387_v26  ;;  %v2390_v59 = vadd.f32 %v2358_v37, %v3981_v15  ;;  %v2357_v25 = vadd.f32 %v4219_v55, %v2321_v22  ;;  %v2324_v12 = vmul.f32 %v3088_v47, %v4214_v54 }
 0x541   :  { %v2264_v38 = vpop.f32.mrf.mxu0 }
 0x542   :  { %2422 = vst [vmem:[#allocation14 + $0xc8] sm:$0xff] %v2390_v59  ;;  %v2389_v58 = vadd.f32 %v2357_v25, %v3973_v11  ;;  %v2360_v48 = vadd.f32 %v4219_v55, %v2324_v12  ;;  %v2323_v24 = vmul.f32 %v4214_v54, %v2264_v38 }
 0x543   :  { %v3091_v29 = vpop.f32.mrf.mxu0 }
 0x544   :  { %2421 = vst [vmem:[#allocation14 + $0xc0] sm:$0xff] %v2389_v58  ;;  %v2392_v0 = vadd.f32 %v2360_v48, %v3967_v50  ;;  %v2359_v34 = vadd.f32 %v4219_v55, %v2323_v24  ;;  %v2326_v15 = vmul.f32 %v3091_v29, %v4214_v54 }
 0x545   :  { %v2274_v57 = vpop.f32.mrf.mxu0 }
 0x546   :  { %2424 = vst [vmem:[#allocation14 + $0xd8] sm:$0xff] %v2392_v0  ;;  %v2391_v35 = vadd.f32 %v2359_v34, %v3959_v31  ;;  %v2362_v45 = vadd.f32 %v4219_v55, %v2326_v15  ;;  %v2325_v11 = vmul.f32 %v4214_v54, %v2274_v57 }
 0x547   :  { %v3094_v60 = vpop.f32.mrf.mxu0 }
 0x548   :  { %2423 = vst [vmem:[#allocation14 + $0xd0] sm:$0xff] %v2391_v35  ;;  %v2394_v43 = vadd.f32 %v2362_v45, %v3951_v23  ;;  %v2361_v32 = vadd.f32 %v4219_v55, %v2325_v11  ;;  %v2328_v50 = vmul.f32 %v3094_v60, %v4214_v54 }
 0x549   :  { %v2284_v51 = vpop.f32.mrf.mxu0 }
 0x54a   :  { %2426 = vst [vmem:[#allocation14 + $0xe8] sm:$0xff] %v2394_v43  ;;  %v2393_v14 = vadd.f32 %v2361_v32, %v3940_v3  ;;  %v2364_v4 = vadd.f32 %v4219_v55, %v2328_v50  ;;  %v2327_v31 = vmul.f32 %v4214_v54, %v2284_v51 }
 0x54c   :  { %2425 = vst [vmem:[#allocation14 + $0xe0] sm:$0xff] %v2393_v14  ;;  %v2396_v17 = vadd.f32 %v2364_v4, %v3943_v13  ;;  %v2363_v10 = vadd.f32 %v4219_v55, %v2327_v31 }
 0x54e   :  { %2428 = vst [vmem:[#allocation14 + $0xf8] sm:$0xff] %v2396_v17  ;;  %v2395_v23 = vadd.f32 %v2363_v10, %v3946_v5 }
 0x550   :  { %2427 = vst [vmem:[#allocation14 + $0xf0] sm:$0xff] %v2395_v23 }
 0x551   :  { %3261 = shalt.err (!%p3258_p6)
}
 0x552   :  { %2440 = dma.vmem_to_hbm [thread:$0]  %s2435_s18, 4096, %s4333_s10, [#allocation5], %s3285_s25, %s3285_s25, %s3286_s26  }
 0x553   :  { %3278 = dma.done.wait [#allocation5], 4096  }
 0x554   :  { %3279 = vsyncadd [#allocation5], 4294963200 }
 0x555   :  { %2444 = vsyncpa [#allocation4], 1 }
 0x556   :  { %2445 = vsyncpa [#allocation7], 1 }
 0x557   :  { %2446 = vsyncpa [#allocation10], 1 }
 0x558   :  { %2447 = vsyncpa [#allocation13], 1 }
 0x559   :  { %2448 = vsyncpa [#allocation5], 1 }

</bundles_post_ra>
